<compile_context>
chip_gen: v5e
topology: v5e:2x2
jax: 0.10.0
libtpu: 0.0.40
codegen_flags: <defaults>
</compile_context>

<pallas_src>
import functools

import jax
import jax.numpy as jnp
from jax import lax
from jax.experimental import pallas as pl
from jax.experimental.pallas import tpu as pltpu


# Raise the scoped VMEM limit explicitly and budget the fused path against a
# double-buffer-aware footprint.  32 MiB scoped / 24 MiB footprint leaves
# headroom on v7x (64 MiB physical) and is far inside v5e/v6e (128 MiB).
_VMEM_LIMIT_BYTES = 32 * 1024 * 1024
_FUSED_VMEM_BUDGET = 24 * 1024 * 1024


def _round_up(x, m):
    return (x + m - 1) // m * m


def _apply_act(y, act, slope):
    if act == "leaky_relu":
        # max(y, a*y) == LeakyReLU for 0 < a < 1 (one VALU op fewer than where).
        return jnp.maximum(y, slope * y)
    if act == "sigmoid":
        # 0.5*(tanh(0.5*y)+1) == sigmoid(y): single EUP op, stays in [0, 1].
        return 0.5 * (jnp.tanh(0.5 * y) + 1.0)
    return y


# ----------------------------------------------------------------------------
# Pallas kernels
# ----------------------------------------------------------------------------
def _fused_body(a_ref, b_ref, bias_ref, o_ref, *, act, bn, eps, slope):
    """One row-tile of O = act(BN?(A @ B [+ bias])).  bf16 operands, f32 math."""
    y = jnp.dot(a_ref[...], b_ref[...], preferred_element_type=jnp.float32)
    if bias_ref is not None:
        y = y + bias_ref[...]
    if bn:
        # BatchNorm2d train-mode batch stats (gamma=1, beta=0).  Activations
        # are [rows=C, lanes=N*Ho*Wo]; the block holds the FULL lane extent so
        # per-channel stats over axis=-1 are exact under Cout row tiling.
        mean = jnp.mean(y, axis=-1, keepdims=True)
        yc = y - mean                                   # hoisted, reused twice
        var = jnp.mean(yc * yc, axis=-1, keepdims=True)  # biased, like torch
        y = yc * lax.rsqrt(var + eps)
    y = _apply_act(y, act, slope)
    o_ref[...] = y.astype(o_ref.dtype)


def _fused_matmul_bias_kernel(a_ref, b_ref, bias_ref, o_ref, *, act, bn, eps, slope):
    _fused_body(a_ref, b_ref, bias_ref, o_ref, act=act, bn=bn, eps=eps, slope=slope)


def _fused_matmul_nobias_kernel(a_ref, b_ref, o_ref, *, act, bn, eps, slope):
    _fused_body(a_ref, b_ref, None, o_ref, act=act, bn=bn, eps=eps, slope=slope)


def _tiled_matmul_kernel(a_ref, b_ref, bias_ref, o_ref, acc_ref, *, act, slope):
    """Tiled O = act(A @ B + bias).  Grid = (M tiles, N tiles, K tiles), K last."""
    k = pl.program_id(2)

    @pl.when(k == 0)
    def _():
        acc_ref[...] = jnp.zeros_like(acc_ref)

    acc_ref[...] += jnp.dot(a_ref[...], b_ref[...],
                            preferred_element_type=jnp.float32)

    @pl.when(k == pl.num_programs(2) - 1)
    def _():
        y = _apply_act(acc_ref[...] + bias_ref[...], act, slope)
        o_ref[...] = y.astype(o_ref.dtype)


def _tiled_matmul_stats_kernel(a_ref, b_ref, o_ref, sum_ref, ssq_ref, acc_ref):
    """Tiled O = A @ B with per-row sum / sum-of-squares fused into the epilogue."""
    j = pl.program_id(1)
    k = pl.program_id(2)

    @pl.when(k == 0)
    def _():
        acc_ref[...] = jnp.zeros_like(acc_ref)

    @pl.when(jnp.logical_and(j == 0, k == 0))
    def _():
        sum_ref[...] = jnp.zeros_like(sum_ref)
        ssq_ref[...] = jnp.zeros_like(ssq_ref)

    acc_ref[...] += jnp.dot(a_ref[...], b_ref[...],
                            preferred_element_type=jnp.float32)

    @pl.when(k == pl.num_programs(2) - 1)
    def _():
        y = acc_ref[...]
        o_ref[...] = y
        # Zero-padded N columns contribute 0, so the stats stay exact.
        sum_ref[...] += jnp.sum(y, axis=1, keepdims=True)
        ssq_ref[...] += jnp.sum(y * y, axis=1, keepdims=True)


def _bn_apply_kernel(x_ref, sum_ref, ssq_ref, o_ref, *, count, eps, slope):
    """Normalize + LeakyReLU given per-channel sum / sum-of-squares."""
    x = x_ref[...]
    inv_n = 1.0 / count
    mean = sum_ref[...] * inv_n
    var = jnp.maximum(ssq_ref[...] * inv_n - mean * mean, 0.0)
    y = (x - mean) * lax.rsqrt(var + eps)
    y = jnp.maximum(y, slope * y)
    o_ref[...] = y.astype(o_ref.dtype)


# ----------------------------------------------------------------------------
# Tiling / VMEM helpers
# ----------------------------------------------------------------------------
def _choose_tile(dim, pref, align):
    """Largest tile <= pref that is a multiple of align, preferably dividing dim."""
    if dim <= pref:
        return dim                         # full dim -> exempt from (8,128) rule
    t = (pref // align) * align
    while t >= align:
        if dim % t == 0:
            return t
        t -= align
    return (pref // align) * align         # no divisor; ragged edge is padded


def _pick_row_tile(M, max_tile=256):
    """Row (Cout) tile for the fused GEMM: divisor of M, multiple of 16."""
    if M <= max_tile:
        return M
    t = (max_tile // 16) * 16
    while t >= 16:
        if M % t == 0:
            return t
        t -= 16
    return M


def _fits_fused(tile_m, K, N_, out_dtype, budget=_FUSED_VMEM_BUDGET):
    """Double-buffer-aware VMEM footprint of one fused-path grid step."""
    out_b = jnp.dtype(out_dtype).itemsize
    footprint = (2 * tile_m * K * 2            # A row tile (bf16), double-buffered
                 + 2 * K * N_ * 2              # full RHS (bf16), counted x2
                 + 2 * tile_m * N_ * out_b     # output block, double-buffered
                 + 3 * tile_m * N_ * 4)        # f32 epilogue temps (y, yc, act)
    return footprint <= budget


# ----------------------------------------------------------------------------
# Matmul wrappers
# ----------------------------------------------------------------------------
def _tiled_matmul(a, b, bias2d, *, act, out_dtype, slope,
                  tm_pref=256, tn_pref=1024, tk_pref=512):
    """Fallback K-last tiled matmul with large MXU-sized tiles."""
    M, K = a.shape
    _, N_ = b.shape
    tm = _choose_tile(M, tm_pref, 16)
    tn = _choose_tile(N_, tn_pref, 128)
    tk = _choose_tile(K, tk_pref, 128)
    Mp, Kp, Np = _round_up(M, tm), _round_up(K, tk), _round_up(N_, tn)
    ap = a if (Mp == M and Kp == K) else jnp.pad(a, ((0, Mp - M), (0, Kp - K)))
    bp = b if (Kp == K and Np == N_) else jnp.pad(b, ((0, Kp - K), (0, Np - N_)))
    if bias2d.shape[0] == 1:                         # row bias [1, N]
        biasp = bias2d if Np == N_ else jnp.pad(bias2d, ((0, 0), (0, Np - N_)))
        bias_spec = pl.BlockSpec((1, tn), lambda i, j, k: (0, j))
    else:                                            # column bias [M, 1]
        biasp = bias2d if Mp == M else jnp.pad(bias2d, ((0, Mp - M), (0, 0)))
        bias_spec = pl.BlockSpec((tm, 1), lambda i, j, k: (i, 0))

    out = pl.pallas_call(
        functools.partial(_tiled_matmul_kernel, act=act, slope=slope),
        out_shape=jax.ShapeDtypeStruct((Mp, Np), out_dtype),
        grid_spec=pltpu.PrefetchScalarGridSpec(
            num_scalar_prefetch=0,
            grid=(Mp // tm, Np // tn, Kp // tk),
            in_specs=[pl.BlockSpec((tm, tk), lambda i, j, k: (i, k)),
                      pl.BlockSpec((tk, tn), lambda i, j, k: (k, j)),
                      bias_spec],
            out_specs=pl.BlockSpec((tm, tn), lambda i, j, k: (i, j)),
            scratch_shapes=[pltpu.VMEM((tm, tn), jnp.float32)]),
        compiler_params=pltpu.CompilerParams(
            dimension_semantics=("parallel", "parallel", "arbitrary"),
            vmem_limit_bytes=_VMEM_LIMIT_BYTES),
    )(ap, bp, biasp)
    return out[:M, :N_]


def _tiled_matmul_bn_lrelu(a, b, *, eps, slope, out_dtype,
                           tm_pref=256, tn_pref=1024, tk_pref=512):
    """Fallback for BN layers too large to fuse: tiled GEMM with per-row
    sum/sumsq accumulated in the last-K epilogue, then one normalize+LeakyReLU
    pass (2 HBM passes total instead of 3)."""
    M, K = a.shape
    _, N_ = b.shape
    tm = _choose_tile(M, tm_pref, 16)
    tn = _choose_tile(N_, tn_pref, 128)
    tk = _choose_tile(K, tk_pref, 128)
    Mp, Kp, Np = _round_up(M, tm), _round_up(K, tk), _round_up(N_, tn)
    ap = a if (Mp == M and Kp == K) else jnp.pad(a, ((0, Mp - M), (0, Kp - K)))
    bp = b if (Kp == K and Np == N_) else jnp.pad(b, ((0, Kp - K), (0, Np - N_)))

    y, sums, ssqs = pl.pallas_call(
        _tiled_matmul_stats_kernel,
        out_shape=(jax.ShapeDtypeStruct((Mp, Np), jnp.float32),
                   jax.ShapeDtypeStruct((Mp, 1), jnp.float32),
                   jax.ShapeDtypeStruct((Mp, 1), jnp.float32)),
        grid_spec=pltpu.PrefetchScalarGridSpec(
            num_scalar_prefetch=0,
            grid=(Mp // tm, Np // tn, Kp // tk),
            in_specs=[pl.BlockSpec((tm, tk), lambda i, j, k: (i, k)),
                      pl.BlockSpec((tk, tn), lambda i, j, k: (k, j))],
            out_specs=(pl.BlockSpec((tm, tn), lambda i, j, k: (i, j)),
                       pl.BlockSpec((tm, 1), lambda i, j, k: (i, 0)),
                       pl.BlockSpec((tm, 1), lambda i, j, k: (i, 0))),
            scratch_shapes=[pltpu.VMEM((tm, tn), jnp.float32)]),
        compiler_params=pltpu.CompilerParams(
            # sums/ssqs blocks are revisited across j and k, so those axes stay
            # "arbitrary"; the row axis is safe to shard across cores.
            dimension_semantics=("parallel", "arbitrary", "arbitrary"),
            vmem_limit_bytes=_VMEM_LIMIT_BYTES),
    )(ap, bp)

    yn = pl.pallas_call(
        functools.partial(_bn_apply_kernel, count=float(N_), eps=eps, slope=slope),
        out_shape=jax.ShapeDtypeStruct((Mp, Np), out_dtype),
        grid=(Np // tn,),
        in_specs=[pl.BlockSpec((Mp, tn), lambda j: (0, j)),
                  pl.BlockSpec((Mp, 1), lambda j: (0, 0)),
                  pl.BlockSpec((Mp, 1), lambda j: (0, 0))],
        out_specs=pl.BlockSpec((Mp, tn), lambda j: (0, j)),
        compiler_params=pltpu.CompilerParams(
            dimension_semantics=("parallel",),
            vmem_limit_bytes=_VMEM_LIMIT_BYTES),
    )(y, sums, ssqs)
    return yn[:M, :N_]


def matmul_fused(a, b, bias2d=None, *, act="none", bn=False, eps=1e-5, slope=0.2,
                 out_dtype=jnp.float32, max_row_tile=256):
    """act(BN?(a @ b [+ bias])).  a:[M,K], b:[K,N].

    Fused path: grid over M row-tiles (full lane dim per block, so per-row BN
    stays exact), bf16 MXU operands, f32 accumulation / epilogue.  The bias is
    never added for BN layers (train-mode mean subtraction cancels it exactly).
    Falls back to large-tile K-last matmul (+ stats-fused BN) when a fused
    block would not fit the double-buffer-aware VMEM budget.
    """
    M, K = a.shape
    K2, N_ = b.shape
    assert K == K2
    a = a.astype(jnp.bfloat16)
    b = b.astype(jnp.bfloat16)
    has_bias = (bias2d is not None) and (not bn)
    if has_bias:
        bias2d = bias2d.astype(jnp.float32)

    tile_m = _pick_row_tile(M, max_row_tile)
    if _fits_fused(tile_m, K, N_, out_dtype):
        in_specs = [pl.BlockSpec((tile_m, K), lambda i: (i, 0)),   # weight row tile
                    pl.BlockSpec((K, N_), lambda i: (0, 0))]       # full RHS, resident
        args = [a, b]
        if has_bias:
            if bias2d.shape == (M, 1):                             # column bias
                in_specs.append(pl.BlockSpec((tile_m, 1), lambda i: (i, 0)))
            else:                                                  # row bias [1, N]
                in_specs.append(pl.BlockSpec((1, N_), lambda i: (0, 0)))
            args.append(bias2d)
            kernel = functools.partial(_fused_matmul_bias_kernel, act=act, bn=bn,
                                       eps=eps, slope=slope)
        else:
            kernel = functools.partial(_fused_matmul_nobias_kernel, act=act, bn=bn,
                                       eps=eps, slope=slope)
        return pl.pallas_call(
            kernel,
            out_shape=jax.ShapeDtypeStruct((M, N_), out_dtype),
            grid=(M // tile_m,),
            in_specs=in_specs,
            out_specs=pl.BlockSpec((tile_m, N_), lambda i: (i, 0)),
            compiler_params=pltpu.CompilerParams(
                dimension_semantics=("parallel",),
                vmem_limit_bytes=_VMEM_LIMIT_BYTES),
        )(*args)

    # ---- large-shape fallback (not exercised at the test config) ----
    if bn:
        # BN layers in this module are always followed by LeakyReLU(0.2).
        return _tiled_matmul_bn_lrelu(a, b, eps=eps, slope=slope, out_dtype=out_dtype)
    bias2d = bias2d if has_bias else jnp.zeros((1, N_), jnp.float32)
    return _tiled_matmul(a, b, bias2d, act=act, out_dtype=out_dtype, slope=slope)


# ----------------------------------------------------------------------------
# Conv lowering glue (channels-first, transposed im2col — XLA ops only)
# ----------------------------------------------------------------------------
def im2col_t(act_flat, C, N, H, W, k=4, s=2, p=1):
    """act_flat: [C, N*H*W] -> patches [k*k*C, N*Ho*Wo] (tap-major, cin-minor)."""
    x = act_flat.reshape(C, N, H, W)
    xp = jnp.pad(x, ((0, 0), (0, 0), (p, p), (p, p)))
    Ho = (H + 2 * p - k) // s + 1
    Wo = (W + 2 * p - k) // s + 1
    taps = []
    for i in range(k):
        for j in range(k):
            taps.append(xp[:, :, i:i + s * Ho:s, j:j + s * Wo:s])  # [C,N,Ho,Wo]
    patches = jnp.stack(taps, axis=0).reshape(k * k * C, N * Ho * Wo)
    return patches, Ho, Wo


def conv_weight_to_gemm(w_oihw):
    """[Cout, Cin, kh, kw] -> [Cout, kh*kw*Cin] (matches im2col_t K ordering)."""
    cout = w_oihw.shape[0]
    return jnp.transpose(w_oihw, (0, 2, 3, 1)).reshape(cout, -1).astype(jnp.bfloat16)


# ----------------------------------------------------------------------------
# Parameter init (deterministic, mirrors _initialize_weights shapes/schemes)
# ----------------------------------------------------------------------------
def init_params(key, len_code, img_channel, nf):
    keys = jax.random.split(key, 6)
    feat_dim = 8 * nf * 2 * 2

    def kaiming_conv(k, cout, cin):
        # kaiming_normal_, mode='fan_out', nonlinearity='relu': std = sqrt(2/(cout*16))
        std = (2.0 / (cout * 4 * 4)) ** 0.5
        return jax.random.normal(k, (cout, cin, 4, 4), jnp.float32) * std

    params = {
        "w1": kaiming_conv(keys[0], nf, img_channel),   "b1": jnp.zeros((nf,), jnp.float32),
        "w2": kaiming_conv(keys[1], nf * 2, nf),        "b2": jnp.zeros((nf * 2,), jnp.float32),
        "w3": kaiming_conv(keys[2], nf * 4, nf * 2),    "b3": jnp.zeros((nf * 4,), jnp.float32),
        "w4": kaiming_conv(keys[3], nf * 8, nf * 4),    "b4": jnp.zeros((nf * 8,), jnp.float32),
        # nn.Linear weights ~ N(0, 0.01), bias = 0, stored PyTorch-style [out, in]
        "wd": jax.random.normal(keys[4], (1, feat_dim), jnp.float32) * 0.01,
        "bd": jnp.zeros((1,), jnp.float32),
        "we": jax.random.normal(keys[5], (len_code, feat_dim), jnp.float32) * 0.01,
        "be": jnp.zeros((len_code,), jnp.float32),
    }
    return params


# ----------------------------------------------------------------------------
# Forward pass (matches Discriminator.forward, train-mode BatchNorm)
# ----------------------------------------------------------------------------
def discriminator_forward(x_nchw, params):
    N, C, H, W = x_nchw.shape
    # NCHW -> channels-first flat [C, N*H*W] in bf16 (GEMM operand dtype).
    act = jnp.transpose(x_nchw, (1, 0, 2, 3)).reshape(C, N * H * W).astype(jnp.bfloat16)

    layer_cfg = [("w1", "b1", False),   # conv1: no BatchNorm
                 ("w2", "b2", True),
                 ("w3", "b3", True),
                 ("w4", "b4", True)]
    C_cur, H_cur, W_cur = C, H, W
    n_layers = len(layer_cfg)
    for idx, (wn, bname, use_bn) in enumerate(layer_cfg):
        patches, Ho, Wo = im2col_t(act, C_cur, N, H_cur, W_cur)
        w2 = conv_weight_to_gemm(params[wn])                    # [Cout, K] bf16
        cout = w2.shape[0]
        last = idx == n_layers - 1
        # bf16 intermediates; f32 when Cout is too small for dense bf16 sublane
        # packing, and f32 for the final feature map (returned to the caller).
        out_dtype = jnp.float32 if (last or cout < 16) else jnp.bfloat16
        # Conv bias before train-mode BN is a mathematical no-op -> drop it.
        bias = None if use_bn else params[bname].reshape(-1, 1)  # [Cout, 1]
        act = matmul_fused(w2, patches, bias, act="leaky_relu",
                           bn=use_bn, out_dtype=out_dtype)       # [Cout, N*Ho*Wo]
        C_cur, H_cur, W_cur = cout, Ho, Wo

    # feat = feat.view(N, -1) with NCHW (C, H, W) flattening order.
    feat = jnp.transpose(act.reshape(C_cur, N, H_cur, W_cur),
                         (1, 0, 2, 3)).reshape(N, -1)            # [N, 8*nf*2*2] f32

    # Merge the two Linear heads into a single GEMM + fused sigmoid.
    w_heads = jnp.concatenate([params["wd"], params["we"]], axis=0)   # [1+L, F]
    b_heads = jnp.concatenate([params["bd"], params["be"]]).reshape(1, -1)
    heads = matmul_fused(feat, jnp.transpose(w_heads), b_heads,
                         act="sigmoid", bn=False, out_dtype=jnp.float32)
    disc = heads[:, :1]
    code = heads[:, 1:]
    return disc, code, feat

# TODO(synk): BatchNorm here uses train-mode batch stats with gamma=1/beta=0 and
# does not track running stats, matching a freshly-initialized model in train();
# eval-mode / trained-BN support would need the running-stat buffers.


if __name__ == "__main__":
    # 32x32 images so the final feature map is 2x2 (matches 8*nf*2*2 head input).
    len_code, img_channel, nf = 16, 3, 8
    batch = 2

    key = jax.random.PRNGKey(0)
    kp, kx = jax.random.split(key)
    params = init_params(kp, len_code, img_channel, nf)
    x = jax.random.normal(kx, (batch, img_channel, 32, 32), jnp.float32)

    fwd = jax.jit(discriminator_forward)
    disc, code, feat = fwd(x, params)
    jax.block_until_ready((disc, code, feat))

    assert disc.shape == (batch, 1)
    assert code.shape == (batch, len_code)
    assert feat.shape == (batch, 8 * nf * 2 * 2)
    assert bool(jnp.all(jnp.isfinite(disc)))
    assert bool(jnp.all(jnp.isfinite(code)))
    assert bool(jnp.all(jnp.isfinite(feat)))
    assert bool(jnp.all((disc >= 0) & (disc <= 1)))
    assert bool(jnp.all((code >= 0) & (code <= 1)))

    print("KERNEL_OK")
</pallas_src>

<mosaic_0001>
module attributes {stable_mosaic.version = 11 : i64} {
  func.func @_fused_matmul_bias_kernel(%arg0: i32, %arg1: memref<8x48xbf16, #tpu.memory_space<vmem>>, %arg2: memref<48x512xbf16, #tpu.memory_space<vmem>>, %arg3: memref<8x1xf32, #tpu.memory_space<vmem>>, %arg4: memref<8x512xf32, #tpu.memory_space<vmem>>) attributes {dimension_semantics = [#tpu.dimension_semantics<parallel>], iteration_bounds = array<i64: 1>, scalar_prefetch = 0 : i64, scratch_operands = 0 : i64, tpu.core_type = #tpu.core_type<tc>, window_params = [{transform_indices = @transform_0, window_bounds = array<i64: 8, 48>}, {pipeline_mode = #tpu.pipeline_mode<synchronous>, transform_indices = @transform_1, window_bounds = array<i64: 48, 512>}, {transform_indices = @transform_2, window_bounds = array<i64: 8, 1>}, {transform_indices = @transform_3, window_bounds = array<i64: 8, 512>}]} {
    %c0 = arith.constant 0 : index
    %c0_0 = arith.constant 0 : index
    %0 = vector.load %arg1[%c0, %c0_0] : memref<8x48xbf16, #tpu.memory_space<vmem>>, vector<8x48xbf16>
    %c0_1 = arith.constant 0 : index
    %c0_2 = arith.constant 0 : index
    %1 = vector.load %arg2[%c0_1, %c0_2] : memref<48x512xbf16, #tpu.memory_space<vmem>>, vector<48x512xbf16>
    %cst = arith.constant dense<0.000000e+00> : vector<8x512xf32>
    %2 = tpu.matmul %0, %1, %cst {dimension_numbers = #tpu.dot_dimension_numbers<[1], [0], [0], [1], [0, 0, 1, 1], [], []>} : vector<8x48xbf16>, vector<48x512xbf16>, vector<8x512xf32> -> vector<8x512xf32>
    %c0_3 = arith.constant 0 : index
    %c0_4 = arith.constant 0 : index
    %3 = vector.load %arg3[%c0_3, %c0_4] : memref<8x1xf32, #tpu.memory_space<vmem>>, vector<8x1xf32>
    %4 = vector.broadcast %3 : vector<8x1xf32> to vector<8x512xf32>
    %5 = arith.addf %2, %4 : vector<8x512xf32>
    %cst_5 = arith.constant 2.000000e-01 : f32
    %6 = vector.broadcast %cst_5 : f32 to vector<8x512xf32>
    %7 = arith.mulf %6, %5 : vector<8x512xf32>
    %8 = arith.maximumf %5, %7 : vector<8x512xf32>
    %c0_6 = arith.constant 0 : index
    %c0_7 = arith.constant 0 : index
    %9 = vector.load %arg4[%c0_6, %c0_7] : memref<8x512xf32, #tpu.memory_space<vmem>>, vector<8x512xf32>
    tpu.vector_store %arg4[%c0_6, %c0_7], %8 {strides = array<i32>} : memref<8x512xf32, #tpu.memory_space<vmem>>, vector<8x512xf32>,
    return
  }
  func.func @transform_0(%arg0: i32) -> (i32, i32) {
    %c0_i32 = arith.constant 0 : i32
    %c0_i32_0 = arith.constant 0 : i32
    return %arg0, %c0_i32 : i32, i32
  }
  func.func @transform_1(%arg0: i32) -> (i32, i32) {
    %c0_i32 = arith.constant 0 : i32
    %c0_i32_0 = arith.constant 0 : i32
    %c0_i32_1 = arith.constant 0 : i32
    return %c0_i32, %c0_i32_0 : i32, i32
  }
  func.func @transform_2(%arg0: i32) -> (i32, i32) {
    %c0_i32 = arith.constant 0 : i32
    %c0_i32_0 = arith.constant 0 : i32
    return %arg0, %c0_i32 : i32, i32
  }
  func.func @transform_3(%arg0: i32) -> (i32, i32) {
    %c0_i32 = arith.constant 0 : i32
    %c0_i32_0 = arith.constant 0 : i32
    return %arg0, %c0_i32 : i32, i32
  }
}

module attributes {stable_mosaic.version = 11 : i64} {
  func.func @_fused_matmul_nobias_kernel(%arg0: i32, %arg1: memref<16x128xbf16, #tpu.memory_space<vmem>>, %arg2: memref<128x128xbf16, #tpu.memory_space<vmem>>, %arg3: memref<16x128xbf16, #tpu.memory_space<vmem>>) attributes {dimension_semantics = [#tpu.dimension_semantics<parallel>], iteration_bounds = array<i64: 1>, scalar_prefetch = 0 : i64, scratch_operands = 0 : i64, tpu.core_type = #tpu.core_type<tc>, window_params = [{transform_indices = @transform_0, window_bounds = array<i64: 16, 128>}, {pipeline_mode = #tpu.pipeline_mode<synchronous>, transform_indices = @transform_1, window_bounds = array<i64: 128, 128>}, {transform_indices = @transform_2, window_bounds = array<i64: 16, 128>}]} {
    %c0 = arith.constant 0 : index
    %c0_0 = arith.constant 0 : index
    %0 = vector.load %arg1[%c0, %c0_0] : memref<16x128xbf16, #tpu.memory_space<vmem>>, vector<16x128xbf16>
    %c0_1 = arith.constant 0 : index
    %c0_2 = arith.constant 0 : index
    %1 = vector.load %arg2[%c0_1, %c0_2] : memref<128x128xbf16, #tpu.memory_space<vmem>>, vector<128x128xbf16>
    %cst = arith.constant dense<0.000000e+00> : vector<16x128xf32>
    %2 = tpu.matmul %0, %1, %cst {dimension_numbers = #tpu.dot_dimension_numbers<[1], [0], [0], [1], [0, 0, 1, 1], [], []>} : vector<16x128xbf16>, vector<128x128xbf16>, vector<16x128xf32> -> vector<16x128xf32>
    %cst_3 = arith.constant dense<0.000000e+00> : vector<16xf32>
    %3 = vector.multi_reduction <add>, %2, %cst_3 [1] : vector<16x128xf32> to vector<16xf32>
    %4 = vector.shape_cast %3 : vector<16xf32> to vector<16x1xf32>
    %cst_4 = arith.constant 1.280000e+02 : f32
    %5 = vector.broadcast %cst_4 : f32 to vector<16x1xf32>
    %6 = arith.divf %4, %5 : vector<16x1xf32>
    %7 = vector.broadcast %6 : vector<16x1xf32> to vector<16x128xf32>
    %8 = arith.subf %2, %7 : vector<16x128xf32>
    %9 = arith.mulf %8, %8 : vector<16x128xf32>
    %cst_5 = arith.constant dense<0.000000e+00> : vector<16xf32>
    %10 = vector.multi_reduction <add>, %9, %cst_5 [1] : vector<16x128xf32> to vector<16xf32>
    %11 = vector.shape_cast %10 : vector<16xf32> to vector<16x1xf32>
    %cst_6 = arith.constant 1.280000e+02 : f32
    %12 = vector.broadcast %cst_6 : f32 to vector<16x1xf32>
    %13 = arith.divf %11, %12 : vector<16x1xf32>
    %cst_7 = arith.constant 9.99999974E-6 : f32
    %14 = vector.broadcast %cst_7 : f32 to vector<16x1xf32>
    %15 = arith.addf %13, %14 : vector<16x1xf32>
    %16 = math.rsqrt %15 : vector<16x1xf32>
    %17 = vector.broadcast %16 : vector<16x1xf32> to vector<16x128xf32>
    %18 = arith.mulf %8, %17 : vector<16x128xf32>
    %cst_8 = arith.constant 2.000000e-01 : f32
    %19 = vector.broadcast %cst_8 : f32 to vector<16x128xf32>
    %20 = arith.mulf %19, %18 : vector<16x128xf32>
    %21 = arith.maximumf %18, %20 : vector<16x128xf32>
    %22 = arith.truncf %21 : vector<16x128xf32> to vector<16x128xbf16>
    %c0_9 = arith.constant 0 : index
    %c0_10 = arith.constant 0 : index
    %23 = vector.load %arg3[%c0_9, %c0_10] : memref<16x128xbf16, #tpu.memory_space<vmem>>, vector<16x128xbf16>
    tpu.vector_store %arg3[%c0_9, %c0_10], %22 {strides = array<i32>} : memref<16x128xbf16, #tpu.memory_space<vmem>>, vector<16x128xbf16>,
    return
  }
  func.func @transform_0(%arg0: i32) -> (i32, i32) {
    %c0_i32 = arith.constant 0 : i32
    %c0_i32_0 = arith.constant 0 : i32
    return %arg0, %c0_i32 : i32, i32
  }
  func.func @transform_1(%arg0: i32) -> (i32, i32) {
    %c0_i32 = arith.constant 0 : i32
    %c0_i32_0 = arith.constant 0 : i32
    %c0_i32_1 = arith.constant 0 : i32
    return %c0_i32, %c0_i32_0 : i32, i32
  }
  func.func @transform_2(%arg0: i32) -> (i32, i32) {
    %c0_i32 = arith.constant 0 : i32
    %c0_i32_0 = arith.constant 0 : i32
    return %arg0, %c0_i32 : i32, i32
  }
}

module attributes {stable_mosaic.version = 11 : i64} {
  func.func @_fused_matmul_nobias_kernel(%arg0: i32, %arg1: memref<32x256xbf16, #tpu.memory_space<vmem>>, %arg2: memref<256x32xbf16, #tpu.memory_space<vmem>>, %arg3: memref<32x32xbf16, #tpu.memory_space<vmem>>) attributes {dimension_semantics = [#tpu.dimension_semantics<parallel>], iteration_bounds = array<i64: 1>, scalar_prefetch = 0 : i64, scratch_operands = 0 : i64, tpu.core_type = #tpu.core_type<tc>, window_params = [{transform_indices = @transform_0, window_bounds = array<i64: 32, 256>}, {pipeline_mode = #tpu.pipeline_mode<synchronous>, transform_indices = @transform_1, window_bounds = array<i64: 256, 32>}, {transform_indices = @transform_2, window_bounds = array<i64: 32, 32>}]} {
    %c0 = arith.constant 0 : index
    %c0_0 = arith.constant 0 : index
    %0 = vector.load %arg1[%c0, %c0_0] : memref<32x256xbf16, #tpu.memory_space<vmem>>, vector<32x256xbf16>
    %c0_1 = arith.constant 0 : index
    %c0_2 = arith.constant 0 : index
    %1 = vector.load %arg2[%c0_1, %c0_2] : memref<256x32xbf16, #tpu.memory_space<vmem>>, vector<256x32xbf16>
    %cst = arith.constant dense<0.000000e+00> : vector<32x32xf32>
    %2 = tpu.matmul %0, %1, %cst {dimension_numbers = #tpu.dot_dimension_numbers<[1], [0], [0], [1], [0, 0, 1, 1], [], []>} : vector<32x256xbf16>, vector<256x32xbf16>, vector<32x32xf32> -> vector<32x32xf32>
    %cst_3 = arith.constant dense<0.000000e+00> : vector<32xf32>
    %3 = vector.multi_reduction <add>, %2, %cst_3 [1] : vector<32x32xf32> to vector<32xf32>
    %4 = vector.shape_cast %3 : vector<32xf32> to vector<32x1xf32>
    %cst_4 = arith.constant 3.200000e+01 : f32
    %5 = vector.broadcast %cst_4 : f32 to vector<32x1xf32>
    %6 = arith.divf %4, %5 : vector<32x1xf32>
    %7 = vector.broadcast %6 : vector<32x1xf32> to vector<32x32xf32>
    %8 = arith.subf %2, %7 : vector<32x32xf32>
    %9 = arith.mulf %8, %8 : vector<32x32xf32>
    %cst_5 = arith.constant dense<0.000000e+00> : vector<32xf32>
    %10 = vector.multi_reduction <add>, %9, %cst_5 [1] : vector<32x32xf32> to vector<32xf32>
    %11 = vector.shape_cast %10 : vector<32xf32> to vector<32x1xf32>
    %cst_6 = arith.constant 3.200000e+01 : f32
    %12 = vector.broadcast %cst_6 : f32 to vector<32x1xf32>
    %13 = arith.divf %11, %12 : vector<32x1xf32>
    %cst_7 = arith.constant 9.99999974E-6 : f32
    %14 = vector.broadcast %cst_7 : f32 to vector<32x1xf32>
    %15 = arith.addf %13, %14 : vector<32x1xf32>
    %16 = math.rsqrt %15 : vector<32x1xf32>
    %17 = vector.broadcast %16 : vector<32x1xf32> to vector<32x32xf32>
    %18 = arith.mulf %8, %17 : vector<32x32xf32>
    %cst_8 = arith.constant 2.000000e-01 : f32
    %19 = vector.broadcast %cst_8 : f32 to vector<32x32xf32>
    %20 = arith.mulf %19, %18 : vector<32x32xf32>
    %21 = arith.maximumf %18, %20 : vector<32x32xf32>
    %22 = arith.truncf %21 : vector<32x32xf32> to vector<32x32xbf16>
    %c0_9 = arith.constant 0 : index
    %c0_10 = arith.constant 0 : index
    %23 = vector.load %arg3[%c0_9, %c0_10] : memref<32x32xbf16, #tpu.memory_space<vmem>>, vector<32x32xbf16>
    tpu.vector_store %arg3[%c0_9, %c0_10], %22 {strides = array<i32>} : memref<32x32xbf16, #tpu.memory_space<vmem>>, vector<32x32xbf16>,
    return
  }
  func.func @transform_0(%arg0: i32) -> (i32, i32) {
    %c0_i32 = arith.constant 0 : i32
    %c0_i32_0 = arith.constant 0 : i32
    return %arg0, %c0_i32 : i32, i32
  }
  func.func @transform_1(%arg0: i32) -> (i32, i32) {
    %c0_i32 = arith.constant 0 : i32
    %c0_i32_0 = arith.constant 0 : i32
    %c0_i32_1 = arith.constant 0 : i32
    return %c0_i32, %c0_i32_0 : i32, i32
  }
  func.func @transform_2(%arg0: i32) -> (i32, i32) {
    %c0_i32 = arith.constant 0 : i32
    %c0_i32_0 = arith.constant 0 : i32
    return %arg0, %c0_i32 : i32, i32
  }
}

module attributes {stable_mosaic.version = 11 : i64} {
  func.func @_fused_matmul_nobias_kernel(%arg0: i32, %arg1: memref<64x512xbf16, #tpu.memory_space<vmem>>, %arg2: memref<512x8xbf16, #tpu.memory_space<vmem>>, %arg3: memref<64x8xf32, #tpu.memory_space<vmem>>) attributes {dimension_semantics = [#tpu.dimension_semantics<parallel>], iteration_bounds = array<i64: 1>, scalar_prefetch = 0 : i64, scratch_operands = 0 : i64, tpu.core_type = #tpu.core_type<tc>, window_params = [{transform_indices = @transform_0, window_bounds = array<i64: 64, 512>}, {pipeline_mode = #tpu.pipeline_mode<synchronous>, transform_indices = @transform_1, window_bounds = array<i64: 512, 8>}, {transform_indices = @transform_2, window_bounds = array<i64: 64, 8>}]} {
    %c0 = arith.constant 0 : index
    %c0_0 = arith.constant 0 : index
    %0 = vector.load %arg1[%c0, %c0_0] : memref<64x512xbf16, #tpu.memory_space<vmem>>, vector<64x512xbf16>
    %c0_1 = arith.constant 0 : index
    %c0_2 = arith.constant 0 : index
    %1 = vector.load %arg2[%c0_1, %c0_2] : memref<512x8xbf16, #tpu.memory_space<vmem>>, vector<512x8xbf16>
    %cst = arith.constant dense<0.000000e+00> : vector<64x8xf32>
    %2 = tpu.matmul %0, %1, %cst {dimension_numbers = #tpu.dot_dimension_numbers<[1], [0], [0], [1], [0, 0, 1, 1], [], []>} : vector<64x512xbf16>, vector<512x8xbf16>, vector<64x8xf32> -> vector<64x8xf32>
    %cst_3 = arith.constant dense<0.000000e+00> : vector<64xf32>
    %3 = vector.multi_reduction <add>, %2, %cst_3 [1] : vector<64x8xf32> to vector<64xf32>
    %4 = vector.shape_cast %3 : vector<64xf32> to vector<64x1xf32>
    %cst_4 = arith.constant 8.000000e+00 : f32
    %5 = vector.broadcast %cst_4 : f32 to vector<64x1xf32>
    %6 = arith.divf %4, %5 : vector<64x1xf32>
    %7 = vector.broadcast %6 : vector<64x1xf32> to vector<64x8xf32>
    %8 = arith.subf %2, %7 : vector<64x8xf32>
    %9 = arith.mulf %8, %8 : vector<64x8xf32>
    %cst_5 = arith.constant dense<0.000000e+00> : vector<64xf32>
    %10 = vector.multi_reduction <add>, %9, %cst_5 [1] : vector<64x8xf32> to vector<64xf32>
    %11 = vector.shape_cast %10 : vector<64xf32> to vector<64x1xf32>
    %cst_6 = arith.constant 8.000000e+00 : f32
    %12 = vector.broadcast %cst_6 : f32 to vector<64x1xf32>
    %13 = arith.divf %11, %12 : vector<64x1xf32>
    %cst_7 = arith.constant 9.99999974E-6 : f32
    %14 = vector.broadcast %cst_7 : f32 to vector<64x1xf32>
    %15 = arith.addf %13, %14 : vector<64x1xf32>
    %16 = math.rsqrt %15 : vector<64x1xf32>
    %17 = vector.broadcast %16 : vector<64x1xf32> to vector<64x8xf32>
    %18 = arith.mulf %8, %17 : vector<64x8xf32>
    %cst_8 = arith.constant 2.000000e-01 : f32
    %19 = vector.broadcast %cst_8 : f32 to vector<64x8xf32>
    %20 = arith.mulf %19, %18 : vector<64x8xf32>
    %21 = arith.maximumf %18, %20 : vector<64x8xf32>
    %c0_9 = arith.constant 0 : index
    %c0_10 = arith.constant 0 : index
    %22 = vector.load %arg3[%c0_9, %c0_10] : memref<64x8xf32, #tpu.memory_space<vmem>>, vector<64x8xf32>
    tpu.vector_store %arg3[%c0_9, %c0_10], %21 {strides = array<i32>} : memref<64x8xf32, #tpu.memory_space<vmem>>, vector<64x8xf32>,
    return
  }
  func.func @transform_0(%arg0: i32) -> (i32, i32) {
    %c0_i32 = arith.constant 0 : i32
    %c0_i32_0 = arith.constant 0 : i32
    return %arg0, %c0_i32 : i32, i32
  }
  func.func @transform_1(%arg0: i32) -> (i32, i32) {
    %c0_i32 = arith.constant 0 : i32
    %c0_i32_0 = arith.constant 0 : i32
    %c0_i32_1 = arith.constant 0 : i32
    return %c0_i32, %c0_i32_0 : i32, i32
  }
  func.func @transform_2(%arg0: i32) -> (i32, i32) {
    %c0_i32 = arith.constant 0 : i32
    %c0_i32_0 = arith.constant 0 : i32
    return %arg0, %c0_i32 : i32, i32
  }
}

module attributes {stable_mosaic.version = 11 : i64} {
  func.func @_fused_matmul_bias_kernel(%arg0: i32, %arg1: memref<2x256xbf16, #tpu.memory_space<vmem>>, %arg2: memref<256x17xbf16, #tpu.memory_space<vmem>>, %arg3: memref<1x17xf32, #tpu.memory_space<vmem>>, %arg4: memref<2x17xf32, #tpu.memory_space<vmem>>) attributes {dimension_semantics = [#tpu.dimension_semantics<parallel>], iteration_bounds = array<i64: 1>, scalar_prefetch = 0 : i64, scratch_operands = 0 : i64, tpu.core_type = #tpu.core_type<tc>, window_params = [{transform_indices = @transform_0, window_bounds = array<i64: 2, 256>}, {pipeline_mode = #tpu.pipeline_mode<synchronous>, transform_indices = @transform_1, window_bounds = array<i64: 256, 17>}, {pipeline_mode = #tpu.pipeline_mode<synchronous>, transform_indices = @transform_2, window_bounds = array<i64: 1, 17>}, {transform_indices = @transform_3, window_bounds = array<i64: 2, 17>}]} {
    %c0 = arith.constant 0 : index
    %c0_0 = arith.constant 0 : index
    %0 = vector.load %arg1[%c0, %c0_0] : memref<2x256xbf16, #tpu.memory_space<vmem>>, vector<2x256xbf16>
    %c0_1 = arith.constant 0 : index
    %c0_2 = arith.constant 0 : index
    %1 = vector.load %arg2[%c0_1, %c0_2] : memref<256x17xbf16, #tpu.memory_space<vmem>>, vector<256x17xbf16>
    %cst = arith.constant dense<0.000000e+00> : vector<2x17xf32>
    %2 = tpu.matmul %0, %1, %cst {dimension_numbers = #tpu.dot_dimension_numbers<[1], [0], [0], [1], [0, 0, 1, 1], [], []>} : vector<2x256xbf16>, vector<256x17xbf16>, vector<2x17xf32> -> vector<2x17xf32>
    %c0_3 = arith.constant 0 : index
    %c0_4 = arith.constant 0 : index
    %3 = vector.load %arg3[%c0_3, %c0_4] : memref<1x17xf32, #tpu.memory_space<vmem>>, vector<1x17xf32>
    %4 = vector.broadcast %3 : vector<1x17xf32> to vector<2x17xf32>
    %5 = arith.addf %2, %4 : vector<2x17xf32>
    %cst_5 = arith.constant 5.000000e-01 : f32
    %6 = vector.broadcast %cst_5 : f32 to vector<2x17xf32>
    %7 = arith.mulf %6, %5 : vector<2x17xf32>
    %8 = math.tanh %7 : vector<2x17xf32>
    %cst_6 = arith.constant 1.000000e+00 : f32
    %9 = vector.broadcast %cst_6 : f32 to vector<2x17xf32>
    %10 = arith.addf %8, %9 : vector<2x17xf32>
    %cst_7 = arith.constant 5.000000e-01 : f32
    %11 = vector.broadcast %cst_7 : f32 to vector<2x17xf32>
    %12 = arith.mulf %11, %10 : vector<2x17xf32>
    %c0_8 = arith.constant 0 : index
    %c0_9 = arith.constant 0 : index
    %13 = vector.load %arg4[%c0_8, %c0_9] : memref<2x17xf32, #tpu.memory_space<vmem>>, vector<2x17xf32>
    tpu.vector_store %arg4[%c0_8, %c0_9], %12 {strides = array<i32>} : memref<2x17xf32, #tpu.memory_space<vmem>>, vector<2x17xf32>,
    return
  }
  func.func @transform_0(%arg0: i32) -> (i32, i32) {
    %c0_i32 = arith.constant 0 : i32
    %c0_i32_0 = arith.constant 0 : i32
    return %arg0, %c0_i32 : i32, i32
  }
  func.func @transform_1(%arg0: i32) -> (i32, i32) {
    %c0_i32 = arith.constant 0 : i32
    %c0_i32_0 = arith.constant 0 : i32
    %c0_i32_1 = arith.constant 0 : i32
    return %c0_i32, %c0_i32_0 : i32, i32
  }
  func.func @transform_2(%arg0: i32) -> (i32, i32) {
    %c0_i32 = arith.constant 0 : i32
    %c0_i32_0 = arith.constant 0 : i32
    %c0_i32_1 = arith.constant 0 : i32
    return %c0_i32, %c0_i32_0 : i32, i32
  }
  func.func @transform_3(%arg0: i32) -> (i32, i32) {
    %c0_i32 = arith.constant 0 : i32
    %c0_i32_0 = arith.constant 0 : i32
    return %arg0, %c0_i32 : i32, i32
  }
}

</mosaic_0001>

<bundles_post_ra>
// kernel: discriminator_forward.5
= control target key start
LH: loop header
LB: loop body
LE: loop exit
PB: predicated region body
PF: predicated region fallthrough
CT: control target
= control target key end

     0   :  { %v232_v3 = vmov 0   ;;  %vm94_vm0 = vcmask 392192   ;;  %s343_s1 = inlined_call_operand.vmem [shape: bf16[48,512], index: 1, kind: input, shape index: {}]   ;;  %s344_s2 = inlined_call_operand.vmem [shape: f32[8,1], index: 2, kind: input, shape index: {}]   ;;  %s345_s0 = inlined_call_operand.vmem [shape: bf16[8,48], index: 0, kind: input, shape index: {}]   ;;  %s346_s3 = inlined_call_operand.vmem [shape: f32[8,512], index: 3, kind: output, shape index: {}]  }
   0x1   :  { %v200_v0 = vld [vmem:[%s343_s1 + $0x40] sm:$0xf]  ;;  %v228_v1 = vld [vmem:[%s343_s1 + $0x4c] sm:$0xf0]  ;;  %v226_v2 = vld [vmem:[%s343_s1 + $0x44] sm:$0xf]  ;;  %231 = vset.pattern.permute.xlu0 %v232_v3 }
   0x2   :  { %v201_v4 = vor.u32 %v228_v1, %v200_v0  ;;  %v202_v5 = vld [vmem:[%s343_s1 + $0x50] sm:$0xf0]  ;;  %v208_v6 = vld [vmem:[%s343_s1 + $0x48] sm:$0xf]  ;;  %v229_v7 = vld [vmem:[%s343_s1 + $0x54] sm:$0xf0] }
   0x3   :  { %v205_v8 = vor.u32 %v226_v2, %v202_v5  ;;  %v209_v9 = vor.u32 %v229_v7, %v208_v6  ;;  %v227_v10 = vld [vmem:[%s343_s1 + $0x4c] sm:$0xf]  ;;  %v210_v11 = vld [vmem:[%s343_s1 + $0x58] sm:$0xf0]  ;;  %v184_v12 = vld [vmem:[%s343_s1 + $0x20] sm:$0xf] }
   0x4   :  { %103 = vmatpush.bf16.msra.mxu0 %v201_v4  ;;  %v213_v13 = vor.u32 %v227_v10, %v210_v11  ;;  %v224_v14 = vld [vmem:[%s343_s1 + $0x2c] sm:$0xf0]  ;;  %v222_v15 = vld [vmem:[%s343_s1 + $0x24] sm:$0xf]  ;;  %v186_v16 = vld [vmem:[%s343_s1 + $0x30] sm:$0xf0] }
   0x5   :  { %116 = vmatpush.bf16.msra.mxu1 %v205_v8  ;;  %129 = vmatpush.bf16.msra.mxu2 %v209_v9  ;;  %v185_v17 = vor.u32 %v224_v14, %v184_v12  ;;  %v189_v18 = vor.u32 %v222_v15, %v186_v16  ;;  %v192_v19 = vld [vmem:[%s343_s1 + $0x28] sm:$0xf]  ;;  %v225_v20 = vld [vmem:[%s343_s1 + $0x34] sm:$0xf0]  ;;  %v223_v21 = vld [vmem:[%s343_s1 + $0x2c] sm:$0xf] }
   0x6   :  { %142 = vmatpush.bf16.msra.mxu3 %v213_v13  ;;  %v193_v22 = vor.u32 %v225_v20, %v192_v19  ;;  %v194_v23 = vld [vmem:[%s343_s1 + $0x38] sm:$0xf0]  ;;  %v168_v24 = vld [vmem:[%s343_s1] sm:$0xf]  ;;  %v220_v25 = vld [vmem:[%s343_s1 + $0xc] sm:$0xf0] }
   0x7   :  { %v197_v26 = vor.u32 %v223_v21, %v194_v23  ;;  %v218_v27 = vld [vmem:[%s343_s1 + $0x4] sm:$0xf]  ;;  %v170_v28 = vld [vmem:[%s343_s1 + $0x10] sm:$0xf0]  ;;  %v176_v29 = vld [vmem:[%s343_s1 + $0x8] sm:$0xf]  ;;  %v169_v30 = vor.u32 %v220_v25, %v168_v24 }
   0x8   :  { %104 = vmatpush.bf16.msra.mxu0 %v185_v17  ;;  %v221_v31 = vld [vmem:[%s343_s1 + $0x14] sm:$0xf0]  ;;  %v219_v32 = vld [vmem:[%s343_s1 + $0xc] sm:$0xf]  ;;  %v178_v33 = vld [vmem:[%s343_s1 + $0x18] sm:$0xf0]  ;;  %v173_v34 = vor.u32 %v218_v27, %v170_v28 }
   0x9   :  { %117 = vmatpush.bf16.msra.mxu1 %v189_v18  ;;  %130 = vmatpush.bf16.msra.mxu2 %v193_v22  ;;  %v177_v35 = vor.u32 %v221_v31, %v176_v29  ;;  %v28_v36 = vld [vmem:[%s344_s2] sm:$0xff]  ;;  %v181_v37 = vor.u32 %v219_v32, %v178_v33 }
   0xa   :  { %143 = vmatpush.bf16.msra.mxu3 %v197_v26  ;;  %31 = vperm.xlu0 %231, %v28_v36   ;;  %v15_v38 = vld [vmem:[%s345_s0] sm:$0xf] }
   0xc   :  { %105 = vmatpush.bf16.msra.mxu0 %v169_v30 }
   0xd   :  { %118 = vmatpush.bf16.msra.mxu1 %v173_v34  ;;  %131 = vmatpush.bf16.msra.mxu2 %v177_v35 }
   0xe   :  { %144 = vmatpush.bf16.msra.mxu3 %v181_v37 }
   0xf   :  { %214 = vmatmul.msk.bf16.vlgmr.msra.gmra.mxu0 %vm94_vm0, %v15_v38 }
  0x10   :  { %215 = vmatmul.msk.bf16.vlgmr.msra.gmra.mxu1 %vm94_vm0, %v15_v38  ;;  %216 = vmatmul.msk.bf16.vlgmr.msra.gmra.mxu2 %vm94_vm0, %v15_v38 }
  0x11   :  { %217 = vmatmul.msk.bf16.vlgmr.msra.gmra.mxu3 %vm94_vm0, %v15_v38 }
  0x7c   :  { %v32_v39 = vpop.permute.xlu0 %31 }
  0x8c   :  { %v107_v40 = vpop.f32.mrf.mxu0 }
  0x8d   :  { %v120_v41 = vpop.f32.mrf.mxu1  ;;  %v108_v42 = vadd.f32 %v107_v40, %v32_v39 }
  0x8e   :  { %v121_v43 = vadd.f32 %v120_v41, %v32_v39 }
  0x8f   :  { %v150_v44 = vmul.f32 0.2, %v108_v42 }
  0x90   :  { %v151_v45 = vmul.f32 0.2, %v121_v43 }
  0x91   :  { %v154_v46 = vmax.f32 %v108_v42, %v150_v44 }
  0x92   :  { %v155_v47 = vmax.f32 %v121_v43, %v151_v45 }
  0x93   :  { %158 = vst [vmem:[%s346_s3] sm:$0xff] %v154_v46  ;;  %v133_v48 = vpop.f32.mrf.mxu2 }
  0x94   :  { %159 = vst [vmem:[%s346_s3 + $0x8] sm:$0xff] %v155_v47  ;;  %v134_v49 = vadd.f32 %v133_v48, %v32_v39  ;;  %v146_v50 = vpop.f32.mrf.mxu3  ;;  %v109_v51 = vpop.f32.mrf.mxu0 }
  0x95   :  { %v147_v52 = vadd.f32 %v146_v50, %v32_v39  ;;  %v122_v53 = vpop.f32.mrf.mxu1 }
  0x96   :  { %v152_v54 = vmul.f32 0.2, %v134_v49 }
  0x97   :  { %v153_v55 = vmul.f32 0.2, %v147_v52 }
  0x98   :  { %v156_v56 = vmax.f32 %v134_v49, %v152_v54 }
  0x99   :  { %v157_v57 = vmax.f32 %v147_v52, %v153_v55 }
  0x9a   :  { %160 = vst [vmem:[%s346_s3 + $0x10] sm:$0xff] %v156_v56 }
  0x9b   :  { %161 = vst [vmem:[%s346_s3 + $0x18] sm:$0xff] %v157_v57  ;;  %v135_v58 = vpop.f32.mrf.mxu2 }
  0x9c   :  { %v148_v59 = vpop.f32.mrf.mxu3 }

// kernel: discriminator_forward.6
= control target key start
LH: loop header
LB: loop body
LE: loop exit
PB: predicated region body
PF: predicated region fallthrough
CT: control target
= control target key end

     0   :  { %v213_v11 = vmov 128.0   ;;  %s259_s1 = inlined_call_operand.vmem [shape: bf16[128,128], index: 1, kind: input, shape index: {}]   ;;  %s260_s0 = inlined_call_operand.vmem [shape: bf16[16,128], index: 0, kind: input, shape index: {}]   ;;  %s261_s2 = inlined_call_operand.vmem [shape: bf16[16,128], index: 2, kind: output, shape index: {}]  }
   0x1   :  { %v200_v0 = vld [vmem:[%s259_s1 + $0x38] sm:$0xff]  ;;  %v199_v1 = vld [vmem:[%s259_s1 + $0x30] sm:$0xff]  ;;  %v198_v2 = vld [vmem:[%s259_s1 + $0x28] sm:$0xff]  ;;  %207 = vrcp.f32 %v213_v11 }
   0x2   :  { %83 = vmatpush.bf16.msra.mxu0 %v200_v0  ;;  %v197_v3 = vld [vmem:[%s259_s1 + $0x20] sm:$0xff]  ;;  %v196_v4 = vld [vmem:[%s259_s1 + $0x18] sm:$0xff]  ;;  %v195_v5 = vld [vmem:[%s259_s1 + $0x10] sm:$0xff] }
   0x3   :  { %v194_v6 = vld [vmem:[%s259_s1 + $0x8] sm:$0xff]  ;;  %v193_v7 = vld [vmem:[%s259_s1] sm:$0xff] }
   0x4   :  { %v192_v8 = vld [vmem:[%s260_s0] sm:$0xff] }
   0x6   :  { %84 = vmatpush.bf16.msra.mxu0 %v199_v1 }
   0x7   :  { %v208_v12 = vpop.eup %207 }
   0x8   :  { %v102_v13 = vmul.f32 128.0, %v208_v12  ;;  %vm106_vm0 = vweird.f32 %v208_v12 }
   0xa   :  { %85 = vmatpush.bf16.msra.mxu0 %v198_v2  ;;  %v103_v14 = vsub.f32 1.0, %v102_v13 }
   0xc   :  { %v104_v15 = vmul.f32 %v208_v12, %v103_v14 }
   0xe   :  { %86 = vmatpush.bf16.msra.mxu0 %v197_v3  ;;  %v105_v16 = vadd.f32 %v208_v12, %v104_v15 }
  0x10   :  { %v107_v17 = vsel %vm106_vm0, %v208_v12, %v105_v16 }
  0x12   :  { %87 = vmatpush.bf16.msra.mxu0 %v196_v4 }
  0x16   :  { %88 = vmatpush.bf16.msra.mxu0 %v195_v5 }
  0x1a   :  { %89 = vmatpush.bf16.msra.mxu0 %v194_v6 }
  0x1e   :  { %90 = vmatpush.bf16.msra.mxu0 %v193_v7 }
  0x21   :  { %91 = vmatmul.bf16.vlgmr.msra.gmra.mxu0 %v192_v8 }
  0x9e   :  { %v92_v9 = vpop.f32.mrf.mxu0 }
  0x9f   :  { %97 = vadd.xlane.f32.xlu0 %v92_v9 }
  0xa6   :  { %v94_v10 = vpop.f32.mrf.mxu0 }
  0xa7   :  { %99 = vadd.xlane.f32.xlu0 %v94_v10 }
 0x112   :  { %v98_v18 = vpop.xlane.xlu0 %97 }
 0x113   :  { %v108_v19 = vmul.f32 %v107_v17, %v98_v18 }
 0x115   :  { %v110_v20 = vsub.f32 %v92_v9, %v108_v19 }
 0x117   :  { %v112_v21 = vmul.f32 %v110_v20, %v110_v20 }
 0x119   :  { %114 = vadd.xlane.f32.xlu1 %v112_v21 }
 0x11a   :  { %v100_v22 = vpop.xlane.xlu0 %99 }
 0x11b   :  { %v109_v23 = vmul.f32 %v107_v17, %v100_v22 }
 0x11d   :  { %v111_v24 = vsub.f32 %v94_v10, %v109_v23 }
 0x11f   :  { %v113_v25 = vmul.f32 %v111_v24, %v111_v24 }
 0x121   :  { %116 = vadd.xlane.f32.xlu1 %v113_v25 }
 0x18c   :  { %v115_v26 = vpop.xlane.xlu1 %114 }
 0x18d   :  { %v118_v27 = vmul.f32 %v115_v26, %v107_v17 }
 0x18f   :  { %v120_v28 = vadd.f32 1e-05, %v118_v27 }
 0x191   :  { %209 = vrsqrt.f32 %v120_v28  ;;  %vm128_vm2 = vweird.f32 %v120_v28 }
 0x194   :  { %v117_v29 = vpop.xlane.xlu1 %116 }
 0x195   :  { %v119_v30 = vmul.f32 %v117_v29, %v107_v17 }
 0x197   :  { %v210_v31 = vpop.eup %209  ;;  %v121_v32 = vadd.f32 1e-05, %v119_v30 }
 0x198   :  { %v123_v33 = vmul.f32 %v210_v31, %v120_v28  ;;  %vm129_vm1 = vweird.f32 %v210_v31 }
 0x199   :  { %211 = vrsqrt.f32 %v121_v32  ;;  %vm130_vm3 = vmor %vm128_vm2, %vm129_vm1  ;;  %vm138_vm5 = vweird.f32 %v121_v32 }
 0x19a   :  { %v124_v34 = vmul.f32 %v210_v31, %v123_v33 }
 0x19c   :  { %v125_v35 = vmul.f32 0.5, %v124_v34 }
 0x19e   :  { %v126_v36 = vsub.f32 1.5, %v125_v35 }
 0x19f   :  { %v212_v37 = vpop.eup %211 }
 0x1a0   :  { %v127_v38 = vmul.f32 %v210_v31, %v126_v36  ;;  %v133_v39 = vmul.f32 %v212_v37, %v121_v32  ;;  %vm139_vm4 = vweird.f32 %v212_v37 }
 0x1a1   :  { %vm140_vm6 = vmor %vm138_vm5, %vm139_vm4 }
 0x1a2   :  { %v134_v40 = vmul.f32 %v212_v37, %v133_v39  ;;  %v131_v41 = vsel %vm130_vm3, %v210_v31, %v127_v38 }
 0x1a3   :  { %v142_v44 = vmul.f32 %v131_v41, %v110_v20 }
 0x1a4   :  { %v135_v42 = vmul.f32 0.5, %v134_v40 }
 0x1a5   :  { %v144_v47 = vmul.f32 0.2, %v142_v44 }
 0x1a6   :  { %v136_v43 = vsub.f32 1.5, %v135_v42 }
 0x1a7   :  { %v146_v50 = vmax.f32 %v142_v44, %v144_v47 }
 0x1a8   :  { %v137_v45 = vmul.f32 %v212_v37, %v136_v43 }
 0x1aa   :  { %v141_v46 = vsel %vm140_vm6, %v212_v37, %v137_v45 }
 0x1ab   :  { %v143_v48 = vmul.f32 %v141_v46, %v111_v24 }
 0x1ad   :  { %v145_v49 = vmul.f32 0.2, %v143_v48 }
 0x1af   :  { %v147_v51 = vmax.f32 %v143_v48, %v145_v49 }
 0x1b1   :  { %v204_v52 = vpack.c.bf16 %v147_v51, %v146_v50 }
 0x1b3   :  { %205 = vst [vmem:[%s261_s2] sm:$0xff] %v204_v52  }

// kernel: discriminator_forward.7
= control target key start
LH: loop header
LB: loop body
LE: loop exit
PB: predicated region body
PF: predicated region fallthrough
CT: control target
= control target key end

     0   :  { %vm201_vm0 = vcmask 261120   ;;  %v445_v44 = vmov 32.0   ;;  %vm309_vm8 = vcmask 257024   ;;  %s572_s1 = inlined_call_operand.vmem [shape: bf16[256,32], index: 1, kind: input, shape index: {}]   ;;  %s573_s0 = inlined_call_operand.vmem [shape: bf16[32,256], index: 0, kind: input, shape index: {}]   ;;  %s574_s2 = inlined_call_operand.vmem [shape: bf16[32,32], index: 2, kind: output, shape index: {}]  }
   0x1   :  { %v409_v0 = vld [vmem:[%s572_s1 + $0x38] sm:$0xff]  ;;  %v408_v2 = vld [vmem:[%s572_s1 + $0x30] sm:$0xff]  ;;  %v407_v4 = vld [vmem:[%s572_s1 + $0x28] sm:$0xff]  ;;  %435 = vrcp.f32 %v445_v44 }
   0x2   :  { %v417_v1 = vld [vmem:[%s572_s1 + $0x78] sm:$0xff]  ;;  %163 = vmatpush.bf16.msra.mxu0 %v409_v0  ;;  %418 = vmatpush.bf16.msra.mxu2 %v409_v0  ;;  %v416_v3 = vld [vmem:[%s572_s1 + $0x70] sm:$0xff]  ;;  %v415_v5 = vld [vmem:[%s572_s1 + $0x68] sm:$0xff] }
   0x3   :  { %182 = vmatpush.bf16.msra.mxu1 %v417_v1  ;;  %426 = vmatpush.bf16.msra.mxu3 %v417_v1  ;;  %v406_v6 = vld [vmem:[%s572_s1 + $0x20] sm:$0xff]  ;;  %v405_v8 = vld [vmem:[%s572_s1 + $0x18] sm:$0xff]  ;;  %v404_v10 = vld [vmem:[%s572_s1 + $0x10] sm:$0xff] }
   0x4   :  { %v414_v7 = vld [vmem:[%s572_s1 + $0x60] sm:$0xff]  ;;  %v413_v9 = vld [vmem:[%s572_s1 + $0x58] sm:$0xff]  ;;  %v412_v11 = vld [vmem:[%s572_s1 + $0x50] sm:$0xff] }
   0x5   :  { %v403_v12 = vld [vmem:[%s572_s1 + $0x8] sm:$0xff]  ;;  %v402_v14 = vld [vmem:[%s572_s1] sm:$0xff]  ;;  %v328_v18 = vld [vmem:[%s573_s0 + $0x10] sm:$0xf] }
   0x6   :  { %164 = vmatpush.bf16.msra.mxu0 %v408_v2  ;;  %419 = vmatpush.bf16.msra.mxu2 %v408_v2  ;;  %v411_v13 = vld [vmem:[%s572_s1 + $0x48] sm:$0xff]  ;;  %v410_v15 = vld [vmem:[%s572_s1 + $0x40] sm:$0xff]  ;;  %v401_v19 = vld [vmem:[%s573_s0 + $0x14] sm:$0xf0] }
   0x7   :  { %183 = vmatpush.bf16.msra.mxu1 %v416_v3  ;;  %427 = vmatpush.bf16.msra.mxu3 %v416_v3  ;;  %v320_v16 = vld [vmem:[%s573_s0] sm:$0xf]  ;;  %v399_v17 = vld [vmem:[%s573_s0 + $0x4] sm:$0xf0]  ;;  %v398_v20 = vld [vmem:[%s573_s0 + $0x4] sm:$0xf]  ;;  %v329_v25 = vor.u32 %v401_v19, %v328_v18  ;;  %v436_v45 = vpop.eup %435 }
   0x8   :  { %v322_v21 = vld [vmem:[%s573_s0 + $0x8] sm:$0xf0]  ;;  %v400_v22 = vld [vmem:[%s573_s0 + $0x14] sm:$0xf]  ;;  %v330_v23 = vld [vmem:[%s573_s0 + $0x18] sm:$0xf0]  ;;  %v321_v24 = vor.u32 %v399_v17, %v320_v16  ;;  %vm219_vm1 = vweird.f32 %v436_v45 }
   0x9   :  { %v325_v26 = vor.u32 %v398_v20, %v322_v21  ;;  %v333_v27 = vor.u32 %v400_v22, %v330_v23  ;;  %v215_v46 = vmul.f32 32.0, %v436_v45 }
   0xa   :  { %165 = vmatpush.bf16.msra.mxu0 %v407_v4  ;;  %420 = vmatpush.bf16.msra.mxu2 %v407_v4 }
   0xb   :  { %184 = vmatpush.bf16.msra.mxu1 %v415_v5  ;;  %428 = vmatpush.bf16.msra.mxu3 %v415_v5  ;;  %v216_v47 = vsub.f32 1.0, %v215_v46 }
   0xd   :  { %v217_v48 = vmul.f32 %v436_v45, %v216_v47 }
   0xe   :  { %166 = vmatpush.bf16.msra.mxu0 %v406_v6  ;;  %421 = vmatpush.bf16.msra.mxu2 %v406_v6 }
   0xf   :  { %185 = vmatpush.bf16.msra.mxu1 %v414_v7  ;;  %429 = vmatpush.bf16.msra.mxu3 %v414_v7  ;;  %v218_v49 = vadd.f32 %v436_v45, %v217_v48 }
  0x11   :  { %v220_v50 = vsel %vm219_vm1, %v436_v45, %v218_v49 }
  0x12   :  { %167 = vmatpush.bf16.msra.mxu0 %v405_v8  ;;  %422 = vmatpush.bf16.msra.mxu2 %v405_v8 }
  0x13   :  { %186 = vmatpush.bf16.msra.mxu1 %v413_v9  ;;  %430 = vmatpush.bf16.msra.mxu3 %v413_v9 }
  0x16   :  { %168 = vmatpush.bf16.msra.mxu0 %v404_v10  ;;  %423 = vmatpush.bf16.msra.mxu2 %v404_v10 }
  0x17   :  { %187 = vmatpush.bf16.msra.mxu1 %v412_v11  ;;  %431 = vmatpush.bf16.msra.mxu3 %v412_v11 }
  0x1a   :  { %169 = vmatpush.bf16.msra.mxu0 %v403_v12  ;;  %424 = vmatpush.bf16.msra.mxu2 %v403_v12 }
  0x1b   :  { %188 = vmatpush.bf16.msra.mxu1 %v411_v13  ;;  %432 = vmatpush.bf16.msra.mxu3 %v411_v13 }
  0x1e   :  { %170 = vmatpush.bf16.msra.mxu0 %v402_v14  ;;  %425 = vmatpush.bf16.msra.mxu2 %v402_v14 }
  0x1f   :  { %189 = vmatpush.bf16.msra.mxu1 %v410_v15  ;;  %433 = vmatpush.bf16.msra.mxu3 %v410_v15 }
  0x21   :  { %171 = vmatmul.bf16.vlgmr.msra.gmra.mxu0 %v321_v24  ;;  %176 = vmatmul.bf16.vlgmr.msra.gmra.mxu2 %v329_v25 }
  0x22   :  { %190 = vmatmul.bf16.vlgmr.msra.gmra.mxu1 %v325_v26  ;;  %195 = vmatmul.bf16.vlgmr.msra.gmra.mxu3 %v333_v27 }
  0x9e   :  { %v172_v28 = vpop.f32.mrf.mxu0 }
  0x9f   :  { %v191_v29 = vpop.f32.mrf.mxu1 }
  0xa0   :  { %v192_v30 = vadd.f32 %v191_v29, %v172_v28 }
  0xa2   :  { %v202_v31 = vsel %vm201_vm0, %v192_v30, 0.0 }
  0xa3   :  { %203 = vadd.xlane.f32.xlu0 %v202_v31 }
  0xa4   :  { %v177_v32 = vpop.f32.mrf.mxu2 }
  0xa5   :  { %v196_v33 = vpop.f32.mrf.mxu3 }
  0xa6   :  { %v197_v34 = vadd.f32 %v196_v33, %v177_v32  ;;  %v174_v35 = vpop.f32.mrf.mxu0 }
  0xa7   :  { %v193_v36 = vpop.f32.mrf.mxu1 }
  0xa8   :  { %v194_v37 = vadd.f32 %v193_v36, %v174_v35  ;;  %v208_v38 = vsel %vm201_vm0, %v197_v34, 0.0 }
  0xa9   :  { %209 = vadd.xlane.f32.xlu1 %v208_v38 }
  0xaa   :  { %v205_v39 = vsel %vm201_vm0, %v194_v37, 0.0 }
  0xab   :  { %206 = vadd.xlane.f32.xlu0 %v205_v39 }
  0xac   :  { %v179_v40 = vpop.f32.mrf.mxu2 }
  0xad   :  { %v198_v41 = vpop.f32.mrf.mxu3 }
  0xae   :  { %v199_v42 = vadd.f32 %v198_v41, %v179_v40 }
  0xb0   :  { %v211_v43 = vsel %vm201_vm0, %v199_v42, 0.0 }
  0xb1   :  { %212 = vadd.xlane.f32.xlu1 %v211_v43 }
 0x116   :  { %v204_v51 = vpop.xlane.xlu0 %203 }
 0x117   :  { %v221_v52 = vmul.f32 %v220_v50, %v204_v51 }
 0x119   :  { %v225_v53 = vsub.f32 %v192_v30, %v221_v52 }
 0x11b   :  { %v229_v54 = vmul.f32 %v225_v53, %v225_v53 }
 0x11c   :  { %v210_v55 = vpop.xlane.xlu1 %209 }
 0x11d   :  { %v223_v56 = vmul.f32 %v220_v50, %v210_v55  ;;  %v233_v57 = vsel %vm201_vm0, %v229_v54, 0.0 }
 0x11e   :  { %234 = vadd.xlane.f32.xlu2 %v233_v57  ;;  %v207_v58 = vpop.xlane.xlu0 %206 }
 0x11f   :  { %v538_v59 = vsub.f32 %v197_v34, %v223_v56  ;;  %v222_v60 = vmul.f32 %v220_v50, %v207_v58 }
 0x121   :  { %v540_v61 = vsub.f32 %v194_v37, %v222_v60  ;;  %v231_v62 = vmul.f32 %v538_v59, %v538_v59 }
 0x123   :  { %v239_v63 = vsel %vm201_vm0, %v231_v62, 0.0  ;;  %v230_v0 = vmul.f32 %v540_v61, %v540_v61 }
 0x124   :  { %v213_v1 = vpop.xlane.xlu1 %212  ;;  %240 = vadd.xlane.f32.xlu0 %v239_v63 }
 0x125   :  { %v224_v2 = vmul.f32 %v220_v50, %v213_v1  ;;  %v236_v3 = vsel %vm201_vm0, %v230_v0, 0.0 }
 0x126   :  { %237 = vadd.xlane.f32.xlu2 %v236_v3 }
 0x127   :  { %v548_v4 = vsub.f32 %v199_v42, %v224_v2 }
 0x129   :  { %v232_v5 = vmul.f32 %v548_v4, %v548_v4 }
 0x12b   :  { %v242_v6 = vsel %vm201_vm0, %v232_v5, 0.0 }
 0x12c   :  { %243 = vadd.xlane.f32.xlu1 %v242_v6 }
 0x191   :  { %v235_v7 = vpop.xlane.xlu2 %234 }
 0x192   :  { %v245_v8 = vmul.f32 %v235_v7, %v220_v50 }
 0x194   :  { %v249_v9 = vadd.f32 1e-05, %v245_v8 }
 0x196   :  { %437 = vrsqrt.f32 %v249_v9  ;;  %vm259_vm3 = vweird.f32 %v249_v9 }
 0x197   :  { %v241_v10 = vpop.xlane.xlu0 %240 }
 0x198   :  { %v247_v11 = vmul.f32 %v241_v10, %v220_v50 }
 0x199   :  { %v238_v12 = vpop.xlane.xlu2 %237 }
 0x19a   :  { %v251_v13 = vadd.f32 1e-05, %v247_v11  ;;  %v246_v14 = vmul.f32 %v238_v12, %v220_v50 }
 0x19c   :  { %v438_v15 = vpop.eup %437  ;;  %439 = vrsqrt.f32 %v251_v13  ;;  %v250_v16 = vadd.f32 1e-05, %v246_v14  ;;  %vm279_vm6 = vweird.f32 %v251_v13 }
 0x19d   :  { %v254_v17 = vmul.f32 %v438_v15, %v249_v9  ;;  %vm260_vm2 = vweird.f32 %v438_v15 }
 0x19e   :  { %441 = vrsqrt.f32 %v250_v16  ;;  %vm261_vm4 = vmor %vm259_vm3, %vm260_vm2  ;;  %vm269_vm10 = vweird.f32 %v250_v16 }
 0x19f   :  { %v255_v18 = vmul.f32 %v438_v15, %v254_v17  ;;  %v244_v19 = vpop.xlane.xlu1 %243 }
 0x1a0   :  { %v248_v20 = vmul.f32 %v244_v19, %v220_v50 }
 0x1a1   :  { %v256_v21 = vmul.f32 0.5, %v255_v18 }
 0x1a2   :  { %v440_v22 = vpop.eup %439  ;;  %v252_v23 = vadd.f32 1e-05, %v248_v20 }
 0x1a3   :  { %v257_v24 = vsub.f32 1.5, %v256_v21  ;;  %v274_v25 = vmul.f32 %v440_v22, %v251_v13  ;;  %vm280_vm5 = vweird.f32 %v440_v22 }
 0x1a4   :  { %v442_v26 = vpop.eup %441  ;;  %443 = vrsqrt.f32 %v252_v23  ;;  %vm281_vm9 = vmor %vm279_vm6, %vm280_vm5  ;;  %vm289_vm13 = vweird.f32 %v252_v23 }
 0x1a5   :  { %v258_v27 = vmul.f32 %v438_v15, %v257_v24  ;;  %v275_v28 = vmul.f32 %v440_v22, %v274_v25  ;;  %v264_v29 = vmul.f32 %v442_v26, %v250_v16  ;;  %vm270_vm7 = vweird.f32 %v442_v26 }
 0x1a6   :  { %vm271_vm11 = vmor %vm269_vm10, %vm270_vm7 }
 0x1a7   :  { %v262_v30 = vsel %vm261_vm4, %v438_v15, %v258_v27  ;;  %v276_v31 = vmul.f32 0.5, %v275_v28  ;;  %v265_v32 = vmul.f32 %v442_v26, %v264_v29 }
 0x1a8   :  { %v293_v33 = vmul.f32 %v262_v30, %v225_v53 }
 0x1a9   :  { %v277_v34 = vsub.f32 1.5, %v276_v31  ;;  %v266_v35 = vmul.f32 0.5, %v265_v32 }
 0x1aa   :  { %v444_v36 = vpop.eup %443  ;;  %v297_v37 = vmul.f32 0.2, %v293_v33 }
 0x1ab   :  { %v278_v38 = vmul.f32 %v440_v22, %v277_v34  ;;  %v267_v39 = vsub.f32 1.5, %v266_v35  ;;  %v284_v40 = vmul.f32 %v444_v36, %v252_v23  ;;  %vm290_vm12 = vweird.f32 %v444_v36 }
 0x1ac   :  { %v301_v41 = vmax.f32 %v293_v33, %v297_v37  ;;  %vm291_vm14 = vmor %vm289_vm13, %vm290_vm12 }
 0x1ad   :  { %v282_v42 = vsel %vm281_vm9, %v440_v22, %v278_v38  ;;  %v268_v43 = vmul.f32 %v442_v26, %v267_v39  ;;  %v285_v44 = vmul.f32 %v444_v36, %v284_v40 }
 0x1ae   :  { %v305_v45 = vpack.c.bf16 %v301_v41, %v301_v41  ;;  %v295_v46 = vmul.f32 %v282_v42, %v538_v59 }
 0x1af   :  { %v272_v47 = vsel %vm271_vm11, %v442_v26, %v268_v43  ;;  %v286_v48 = vmul.f32 0.5, %v285_v44 }
 0x1b0   :  { %310 = vst.msk [vmem:[%s574_s2] sm:$0xf] %vm309_vm8, %v305_v45  ;;  %v299_v49 = vmul.f32 0.2, %v295_v46  ;;  %v294_v50 = vmul.f32 %v272_v47, %v540_v61 }
 0x1b1   :  { %v287_v51 = vsub.f32 1.5, %v286_v48 }
 0x1b2   :  { %v303_v52 = vmax.f32 %v295_v46, %v299_v49  ;;  %v298_v53 = vmul.f32 0.2, %v294_v50 }
 0x1b3   :  { %v288_v54 = vmul.f32 %v444_v36, %v287_v51 }
 0x1b4   :  { %v307_v55 = vpack.c.bf16 %v303_v52, %v303_v52  ;;  %v302_v56 = vmax.f32 %v294_v50, %v298_v53 }
 0x1b5   :  { %v292_v57 = vsel %vm291_vm14, %v444_v36, %v288_v54 }
 0x1b6   :  { %312 = vst.msk [vmem:[%s574_s2 + $0x8] sm:$0xf] %vm309_vm8, %v307_v55  ;;  %v306_v58 = vpack.c.bf16 %v302_v56, %v302_v56  ;;  %v296_v59 = vmul.f32 %v292_v57, %v548_v4 }
 0x1b8   :  { %311 = vst.msk [vmem:[%s574_s2 + $0x4] sm:$0xf] %vm309_vm8, %v306_v58  ;;  %v300_v60 = vmul.f32 0.2, %v296_v59 }
 0x1ba   :  { %v304_v61 = vmax.f32 %v296_v59, %v300_v60 }
 0x1bc   :  { %v308_v62 = vpack.c.bf16 %v304_v61, %v304_v61 }
 0x1be   :  { %313 = vst.msk [vmem:[%s574_s2 + $0xc] sm:$0xf] %vm309_vm8, %v308_v62 }

// kernel: discriminator_forward.9
= control target key start
LH: loop header
LB: loop body
LE: loop exit
PB: predicated region body
PF: predicated region fallthrough
CT: control target
= control target key end

     0   :  { %vm183_vm0 = vcmask 132096   ;;  %s349_s1 = inlined_call_operand.vmem [shape: bf16[256,17], index: 1, kind: input, shape index: {}]   ;;  %s350_s0 = inlined_call_operand.vmem [shape: bf16[2,256], index: 0, kind: input, shape index: {}]   ;;  %s351_s2 = inlined_call_operand.vmem [shape: f32[1,17], index: 2, kind: input, shape index: {}]   ;;  %s352_s3 = inlined_call_operand.vmem [shape: f32[2,17], index: 3, kind: output, shape index: {}]  }
   0x1   :  { %v260_v0 = vld [vmem:[%s349_s1 + $0x38] sm:$0xff]  ;;  %v259_v2 = vld [vmem:[%s349_s1 + $0x30] sm:$0xff]  ;;  %v14_v4 = vld [vmem:[%s350_s0] sm:$0x3] }
   0x2   :  { %v268_v1 = vld [vmem:[%s349_s1 + $0x78] sm:$0xff]  ;;  %153 = vmatpush.bf16.msra.mxu0 %v260_v0  ;;  %v267_v3 = vld [vmem:[%s349_s1 + $0x70] sm:$0xff]  ;;  %v258_v5 = vld [vmem:[%s349_s1 + $0x28] sm:$0xff]  ;;  %52 = vst [vmem:[#allocation1] ss:$9 sm:$0xff] %v14_v4 }
   0x3   :  { %166 = vmatpush.bf16.msra.mxu1 %v268_v1  ;;  %v266_v6 = vld [vmem:[%s349_s1 + $0x68] sm:$0xff]  ;;  %v257_v7 = vld [vmem:[%s349_s1 + $0x20] sm:$0xff]  ;;  %v256_v9 = vld [vmem:[%s349_s1 + $0x18] sm:$0xff] }
   0x4   :  { %v265_v8 = vld [vmem:[%s349_s1 + $0x60] sm:$0xff]  ;;  %v264_v10 = vld [vmem:[%s349_s1 + $0x58] sm:$0xff]  ;;  %v255_v11 = vld [vmem:[%s349_s1 + $0x10] sm:$0xff] }
   0x5   :  { %v263_v12 = vld [vmem:[%s349_s1 + $0x50] sm:$0xff]  ;;  %v254_v13 = vld [vmem:[%s349_s1 + $0x8] sm:$0xff]  ;;  %v253_v15 = vld [vmem:[%s349_s1] sm:$0xff] }
   0x6   :  { %154 = vmatpush.bf16.msra.mxu0 %v259_v2  ;;  %v262_v14 = vld [vmem:[%s349_s1 + $0x48] sm:$0xff]  ;;  %v261_v16 = vld [vmem:[%s349_s1 + $0x40] sm:$0xff] }
   0x7   :  { %167 = vmatpush.bf16.msra.mxu1 %v267_v3  ;;  %v269_v19 = vld [vmem:[%s351_s2] ss:$0 sm:$0xff] }
   0x9   :  { %v53_v17 = vld [vmem:[#allocation1] sm:$0xff]  ;;  %v54_v18 = vld [vmem:[#allocation1 + $0x9] sm:$0xff] }
   0xa   :  { %155 = vmatpush.bf16.msra.mxu0 %v258_v5 }
   0xb   :  { %168 = vmatpush.bf16.msra.mxu1 %v266_v6 }
   0xe   :  { %156 = vmatpush.bf16.msra.mxu0 %v257_v7 }
   0xf   :  { %169 = vmatpush.bf16.msra.mxu1 %v265_v8 }
  0x12   :  { %157 = vmatpush.bf16.msra.mxu0 %v256_v9 }
  0x13   :  { %170 = vmatpush.bf16.msra.mxu1 %v264_v10 }
  0x16   :  { %158 = vmatpush.bf16.msra.mxu0 %v255_v11 }
  0x17   :  { %171 = vmatpush.bf16.msra.mxu1 %v263_v12 }
  0x1a   :  { %159 = vmatpush.bf16.msra.mxu0 %v254_v13 }
  0x1b   :  { %172 = vmatpush.bf16.msra.mxu1 %v262_v14 }
  0x1e   :  { %160 = vmatpush.bf16.msra.mxu0 %v253_v15 }
  0x1f   :  { %173 = vmatpush.bf16.msra.mxu1 %v261_v16 }
  0x21   :  { %161 = vmatmul.bf16.vlgmr.msra.gmra.mxu0 %v53_v17 }
  0x22   :  { %174 = vmatmul.bf16.vlgmr.msra.gmra.mxu1 %v54_v18 }
  0x9e   :  { %v162_v20 = vpop.f32.mrf.mxu0 }
  0x9f   :  { %v175_v21 = vpop.f32.mrf.mxu1  ;;  %v163_v22 = vadd.f32 %v269_v19, %v162_v20 }
  0xa1   :  { %v176_v23 = vadd.f32 %v175_v21, %v163_v22 }
  0xa3   :  { %v179_v24 = vmul.f32 0.5, %v176_v23 }
  0xa5   :  { %270 = vtanh.f32 %v179_v24 }
  0xa6   :  { %v164_v25 = vpop.f32.mrf.mxu0 }
  0xa7   :  { %v177_v26 = vpop.f32.mrf.mxu1 }
  0xab   :  { %v271_v27 = vpop.eup %270 }
  0xac   :  { %v181_v28 = vadd.f32 1.0, %v271_v27 }
  0xae   :  { %v182_v29 = vmul.f32 0.5, %v181_v28 }
  0xb0   :  { %184 = vst.msk [vmem:[%s352_s3] sm:$0x3] %vm183_vm0, %v182_v29 }

// kernel: discriminator_forward.8
= control target key start
LH: loop header
LB: loop body
LE: loop exit
PB: predicated region body
PF: predicated region fallthrough
CT: control target
= control target key end

     0   :  { %vm479_vm0 = vcmask 64512   ;;  %s1284_s1 = inlined_call_operand.vmem [shape: bf16[512,8], index: 1, kind: input, shape index: {}]   ;;  %s1285_s0 = inlined_call_operand.vmem [shape: bf16[64,512], index: 0, kind: input, shape index: {}]   ;;  %s1286_s2 = inlined_call_operand.vmem [shape: f32[64,8], index: 2, kind: output, shape index: {}]  }
   0x1   :  { %v906_v0 = vld [vmem:[%s1284_s1 + $0x38] sm:$0xff]  ;;  %v905_v4 = vld [vmem:[%s1284_s1 + $0x30] sm:$0xff]  ;;  %v904_v8 = vld [vmem:[%s1284_s1 + $0x28] sm:$0xff] }
   0x2   :  { %v914_v1 = vld [vmem:[%s1284_s1 + $0x78] sm:$0xff]  ;;  %363 = vmatpush.bf16.msra.mxu0 %v906_v0  ;;  %v913_v5 = vld [vmem:[%s1284_s1 + $0x70] sm:$0xff]  ;;  %v912_v9 = vld [vmem:[%s1284_s1 + $0x68] sm:$0xff] }
   0x3   :  { %v922_v2 = vld [vmem:[%s1284_s1 + $0xb8] sm:$0xff]  ;;  %392 = vmatpush.bf16.msra.mxu1 %v914_v1  ;;  %v921_v6 = vld [vmem:[%s1284_s1 + $0xb0] sm:$0xff]  ;;  %v920_v10 = vld [vmem:[%s1284_s1 + $0xa8] sm:$0xff] }
   0x4   :  { %v930_v3 = vld [vmem:[%s1284_s1 + $0xf8] sm:$0xff]  ;;  %421 = vmatpush.bf16.msra.mxu2 %v922_v2  ;;  %v929_v7 = vld [vmem:[%s1284_s1 + $0xf0] sm:$0xff]  ;;  %v928_v11 = vld [vmem:[%s1284_s1 + $0xe8] sm:$0xff] }
   0x5   :  { %450 = vmatpush.bf16.msra.mxu3 %v930_v3  ;;  %v903_v12 = vld [vmem:[%s1284_s1 + $0x20] sm:$0xff]  ;;  %v902_v16 = vld [vmem:[%s1284_s1 + $0x18] sm:$0xff]  ;;  %v901_v20 = vld [vmem:[%s1284_s1 + $0x10] sm:$0xff] }
   0x6   :  { %364 = vmatpush.bf16.msra.mxu0 %v905_v4  ;;  %v911_v13 = vld [vmem:[%s1284_s1 + $0x60] sm:$0xff]  ;;  %v910_v17 = vld [vmem:[%s1284_s1 + $0x58] sm:$0xff]  ;;  %v909_v21 = vld [vmem:[%s1284_s1 + $0x50] sm:$0xff] }
   0x7   :  { %393 = vmatpush.bf16.msra.mxu1 %v913_v5  ;;  %v919_v14 = vld [vmem:[%s1284_s1 + $0xa0] sm:$0xff]  ;;  %v918_v18 = vld [vmem:[%s1284_s1 + $0x98] sm:$0xff]  ;;  %v917_v22 = vld [vmem:[%s1284_s1 + $0x90] sm:$0xff] }
   0x8   :  { %422 = vmatpush.bf16.msra.mxu2 %v921_v6  ;;  %v927_v15 = vld [vmem:[%s1284_s1 + $0xe0] sm:$0xff]  ;;  %v926_v19 = vld [vmem:[%s1284_s1 + $0xd8] sm:$0xff]  ;;  %v925_v23 = vld [vmem:[%s1284_s1 + $0xd0] sm:$0xff] }
   0x9   :  { %451 = vmatpush.bf16.msra.mxu3 %v929_v7  ;;  %v900_v24 = vld [vmem:[%s1284_s1 + $0x8] sm:$0xff]  ;;  %v899_v28 = vld [vmem:[%s1284_s1] sm:$0xff]  ;;  %v885_v33 = vld [vmem:[%s1285_s0 + $0xc] sm:$0xf0] }
   0xa   :  { %365 = vmatpush.bf16.msra.mxu0 %v904_v8  ;;  %v908_v25 = vld [vmem:[%s1284_s1 + $0x48] sm:$0xff]  ;;  %v907_v29 = vld [vmem:[%s1284_s1 + $0x40] sm:$0xff]  ;;  %v695_v35 = vld [vmem:[%s1285_s0 + $0x10] sm:$0xf0] }
   0xb   :  { %394 = vmatpush.bf16.msra.mxu1 %v912_v9  ;;  %v916_v26 = vld [vmem:[%s1284_s1 + $0x88] sm:$0xff]  ;;  %v915_v30 = vld [vmem:[%s1284_s1 + $0x80] sm:$0xff]  ;;  %v886_v37 = vld [vmem:[%s1285_s0 + $0x14] sm:$0xf0] }
   0xc   :  { %423 = vmatpush.bf16.msra.mxu2 %v920_v10  ;;  %v924_v27 = vld [vmem:[%s1284_s1 + $0xc8] sm:$0xff]  ;;  %v923_v31 = vld [vmem:[%s1284_s1 + $0xc0] sm:$0xff]  ;;  %v703_v39 = vld [vmem:[%s1285_s0 + $0x18] sm:$0xf0] }
   0xd   :  { %452 = vmatpush.bf16.msra.mxu3 %v928_v11  ;;  %v693_v32 = vld [vmem:[%s1285_s0] sm:$0xf]  ;;  %v883_v34 = vld [vmem:[%s1285_s0 + $0x4] sm:$0xf]  ;;  %v701_v36 = vld [vmem:[%s1285_s0 + $0x8] sm:$0xf] }
   0xe   :  { %366 = vmatpush.bf16.msra.mxu0 %v903_v12  ;;  %v884_v38 = vld [vmem:[%s1285_s0 + $0xc] sm:$0xf]  ;;  %v694_v40 = vor.u32 %v885_v33, %v693_v32  ;;  %v698_v41 = vor.u32 %v883_v34, %v695_v35  ;;  %v702_v42 = vor.u32 %v886_v37, %v701_v36  ;;  %v709_v44 = vld [vmem:[%s1285_s0 + $0x20] sm:$0xf]  ;;  %v889_v45 = vld [vmem:[%s1285_s0 + $0x2c] sm:$0xf0] }
   0xf   :  { %395 = vmatpush.bf16.msra.mxu1 %v911_v13  ;;  %v706_v43 = vor.u32 %v884_v38, %v703_v39  ;;  %v887_v46 = vld [vmem:[%s1285_s0 + $0x24] sm:$0xf]  ;;  %v711_v47 = vld [vmem:[%s1285_s0 + $0x30] sm:$0xf0]  ;;  %v717_v48 = vld [vmem:[%s1285_s0 + $0x28] sm:$0xf]  ;;  %v710_v52 = vor.u32 %v889_v45, %v709_v44 }
  0x10   :  { %424 = vmatpush.bf16.msra.mxu2 %v919_v14  ;;  %v890_v49 = vld [vmem:[%s1285_s0 + $0x34] sm:$0xf0]  ;;  %v888_v50 = vld [vmem:[%s1285_s0 + $0x2c] sm:$0xf]  ;;  %v719_v51 = vld [vmem:[%s1285_s0 + $0x38] sm:$0xf0]  ;;  %v714_v53 = vor.u32 %v887_v46, %v711_v47 }
  0x11   :  { %453 = vmatpush.bf16.msra.mxu3 %v927_v15  ;;  %v718_v54 = vor.u32 %v890_v49, %v717_v48  ;;  %v722_v55 = vor.u32 %v888_v50, %v719_v51  ;;  %v725_v56 = vld [vmem:[%s1285_s0 + $0x40] sm:$0xf]  ;;  %v893_v57 = vld [vmem:[%s1285_s0 + $0x4c] sm:$0xf0]  ;;  %v891_v58 = vld [vmem:[%s1285_s0 + $0x44] sm:$0xf] }
  0x12   :  { %367 = vmatpush.bf16.msra.mxu0 %v902_v16  ;;  %v727_v59 = vld [vmem:[%s1285_s0 + $0x50] sm:$0xf0]  ;;  %v733_v60 = vld [vmem:[%s1285_s0 + $0x48] sm:$0xf]  ;;  %v894_v61 = vld [vmem:[%s1285_s0 + $0x54] sm:$0xf0]  ;;  %v726_v0 = vor.u32 %v893_v57, %v725_v56 }
  0x13   :  { %396 = vmatpush.bf16.msra.mxu1 %v910_v17  ;;  %v892_v62 = vld [vmem:[%s1285_s0 + $0x4c] sm:$0xf]  ;;  %v735_v63 = vld [vmem:[%s1285_s0 + $0x58] sm:$0xf0]  ;;  %v730_v1 = vor.u32 %v891_v58, %v727_v59  ;;  %v734_v2 = vor.u32 %v894_v61, %v733_v60  ;;  %v741_v4 = vld [vmem:[%s1285_s0 + $0x60] sm:$0xf] }
  0x14   :  { %425 = vmatpush.bf16.msra.mxu2 %v918_v18  ;;  %v738_v3 = vor.u32 %v892_v62, %v735_v63  ;;  %v897_v5 = vld [vmem:[%s1285_s0 + $0x6c] sm:$0xf0]  ;;  %v895_v6 = vld [vmem:[%s1285_s0 + $0x64] sm:$0xf]  ;;  %v743_v7 = vld [vmem:[%s1285_s0 + $0x70] sm:$0xf0] }
  0x15   :  { %454 = vmatpush.bf16.msra.mxu3 %v926_v19  ;;  %v749_v8 = vld [vmem:[%s1285_s0 + $0x68] sm:$0xf]  ;;  %v898_v9 = vld [vmem:[%s1285_s0 + $0x74] sm:$0xf0]  ;;  %v896_v10 = vld [vmem:[%s1285_s0 + $0x6c] sm:$0xf]  ;;  %v742_v12 = vor.u32 %v897_v5, %v741_v4  ;;  %v746_v13 = vor.u32 %v895_v6, %v743_v7 }
  0x16   :  { %368 = vmatpush.bf16.msra.mxu0 %v901_v20  ;;  %v751_v11 = vld [vmem:[%s1285_s0 + $0x78] sm:$0xf0]  ;;  %v750_v14 = vor.u32 %v898_v9, %v749_v8 }
  0x17   :  { %397 = vmatpush.bf16.msra.mxu1 %v909_v21  ;;  %v754_v15 = vor.u32 %v896_v10, %v751_v11 }
  0x18   :  { %426 = vmatpush.bf16.msra.mxu2 %v917_v22 }
  0x19   :  { %455 = vmatpush.bf16.msra.mxu3 %v925_v23 }
  0x1a   :  { %369 = vmatpush.bf16.msra.mxu0 %v900_v24 }
  0x1b   :  { %398 = vmatpush.bf16.msra.mxu1 %v908_v25 }
  0x1c   :  { %427 = vmatpush.bf16.msra.mxu2 %v916_v26 }
  0x1d   :  { %456 = vmatpush.bf16.msra.mxu3 %v924_v27 }
  0x1e   :  { %370 = vmatpush.bf16.msra.mxu0 %v899_v28 }
  0x1f   :  { %399 = vmatpush.bf16.msra.mxu1 %v907_v29 }
  0x20   :  { %428 = vmatpush.bf16.msra.mxu2 %v915_v30 }
  0x21   :  { %457 = vmatpush.bf16.msra.mxu3 %v923_v31  ;;  %371 = vmatmul.bf16.vlgmr.msra.gmra.mxu0 %v694_v40 }
  0x22   :  { %400 = vmatmul.bf16.vlgmr.msra.gmra.mxu1 %v698_v41 }
  0x23   :  { %429 = vmatmul.bf16.vlgmr.msra.gmra.mxu2 %v702_v42 }
  0x24   :  { %458 = vmatmul.bf16.vlgmr.msra.gmra.mxu3 %v706_v43 }
  0x31   :  { %376 = vmatmul.bf16.gmra.mxu0 %v710_v52 }
  0x32   :  { %405 = vmatmul.bf16.gmra.mxu1 %v714_v53 }
  0x33   :  { %434 = vmatmul.bf16.gmra.mxu2 %v718_v54 }
  0x34   :  { %463 = vmatmul.bf16.gmra.mxu3 %v722_v55 }
  0x41   :  { %381 = vmatmul.bf16.gmra.mxu0 %v726_v0 }
  0x42   :  { %410 = vmatmul.bf16.gmra.mxu1 %v730_v1 }
  0x43   :  { %439 = vmatmul.bf16.gmra.mxu2 %v734_v2 }
  0x44   :  { %468 = vmatmul.bf16.gmra.mxu3 %v738_v3 }
  0x51   :  { %386 = vmatmul.bf16.gmra.mxu0 %v742_v12 }
  0x52   :  { %415 = vmatmul.bf16.gmra.mxu1 %v746_v13 }
  0x53   :  { %444 = vmatmul.bf16.gmra.mxu2 %v750_v14 }
  0x54   :  { %473 = vmatmul.bf16.gmra.mxu3 %v754_v15 }
  0x9e   :  { %v372_v16 = vpop.f32.mrf.mxu0 }
  0x9f   :  { %v401_v17 = vpop.f32.mrf.mxu1 }
  0xa0   :  { %v402_v18 = vadd.f32 %v401_v17, %v372_v16  ;;  %v950_v16 = vmov 8.0  }
  0xa1   :  { %932 = vrcp.f32 %v950_v16 }
  0xa6   :  { %v430_v19 = vpop.f32.mrf.mxu2  ;;  %v374_v22 = vpop.f32.mrf.mxu0 }
  0xa7   :  { %v459_v20 = vpop.f32.mrf.mxu3  ;;  %v431_v21 = vadd.f32 %v430_v19, %v402_v18  ;;  %v403_v23 = vpop.f32.mrf.mxu1 }
  0xa8   :  { %v404_v26 = vadd.f32 %v403_v23, %v374_v22  ;;  %v933_v17 = vpop.eup %932 }
  0xa9   :  { %v1158_v24 = vadd.f32 %v459_v20, %v431_v21  ;;  %v505_v18 = vmul.f32 8.0, %v933_v17  ;;  %vm509_vm1 = vweird.f32 %v933_v17 }
  0xab   :  { %v480_v25 = vsel %vm479_vm0, %v1158_v24, 0.0  ;;  %v506_v19 = vsub.f32 1.0, %v505_v18 }
  0xac   :  { %481 = vadd.xlane.f32.xlu0 %v480_v25 }
  0xad   :  { %v507_v20 = vmul.f32 %v933_v17, %v506_v19 }
  0xae   :  { %v432_v27 = vpop.f32.mrf.mxu2  ;;  %v377_v30 = vpop.f32.mrf.mxu0 }
  0xaf   :  { %v461_v28 = vpop.f32.mrf.mxu3  ;;  %v433_v29 = vadd.f32 %v432_v27, %v404_v26  ;;  %v406_v31 = vpop.f32.mrf.mxu1  ;;  %v508_v21 = vadd.f32 %v933_v17, %v507_v20 }
  0xb0   :  { %v407_v33 = vadd.f32 %v406_v31, %v377_v30 }
  0xb1   :  { %v1162_v32 = vadd.f32 %v461_v28, %v433_v29  ;;  %v1181_v22 = vsel %vm509_vm1, %v933_v17, %v508_v21 }
  0xb3   :  { %v483_v34 = vsel %vm479_vm0, %v1162_v32, 0.0 }
  0xb4   :  { %484 = vadd.xlane.f32.xlu0 %v483_v34 }
  0xb6   :  { %v435_v35 = vpop.f32.mrf.mxu2  ;;  %v379_v38 = vpop.f32.mrf.mxu0 }
  0xb7   :  { %v464_v36 = vpop.f32.mrf.mxu3  ;;  %v436_v37 = vadd.f32 %v435_v35, %v407_v33  ;;  %v408_v39 = vpop.f32.mrf.mxu1 }
  0xb8   :  { %v409_v42 = vadd.f32 %v408_v39, %v379_v38 }
  0xb9   :  { %v1166_v40 = vadd.f32 %v464_v36, %v436_v37 }
  0xbb   :  { %v486_v41 = vsel %vm479_vm0, %v1166_v40, 0.0 }
  0xbc   :  { %487 = vadd.xlane.f32.xlu1 %v486_v41 }
  0xbe   :  { %v437_v43 = vpop.f32.mrf.mxu2  ;;  %v382_v46 = vpop.f32.mrf.mxu0 }
  0xbf   :  { %v466_v44 = vpop.f32.mrf.mxu3  ;;  %v438_v45 = vadd.f32 %v437_v43, %v409_v42  ;;  %v411_v47 = vpop.f32.mrf.mxu1 }
  0xc0   :  { %v412_v49 = vadd.f32 %v411_v47, %v382_v46 }
  0xc1   :  { %v1170_v48 = vadd.f32 %v466_v44, %v438_v45 }
  0xc3   :  { %v489_v50 = vsel %vm479_vm0, %v1170_v48, 0.0 }
  0xc4   :  { %490 = vadd.xlane.f32.xlu1 %v489_v50 }
  0xc6   :  { %v440_v51 = vpop.f32.mrf.mxu2  ;;  %v384_v54 = vpop.f32.mrf.mxu0 }
  0xc7   :  { %v469_v52 = vpop.f32.mrf.mxu3  ;;  %v441_v53 = vadd.f32 %v440_v51, %v412_v49  ;;  %v413_v55 = vpop.f32.mrf.mxu1 }
  0xc8   :  { %v414_v58 = vadd.f32 %v413_v55, %v384_v54 }
  0xc9   :  { %v1174_v56 = vadd.f32 %v469_v52, %v441_v53 }
  0xcb   :  { %v492_v57 = vsel %vm479_vm0, %v1174_v56, 0.0 }
  0xcc   :  { %493 = vadd.xlane.f32.xlu2 %v492_v57 }
  0xce   :  { %v442_v59 = vpop.f32.mrf.mxu2  ;;  %v387_v62 = vpop.f32.mrf.mxu0 }
  0xcf   :  { %v471_v60 = vpop.f32.mrf.mxu3  ;;  %v443_v61 = vadd.f32 %v442_v59, %v414_v58  ;;  %v416_v63 = vpop.f32.mrf.mxu1 }
  0xd0   :  { %v417_v1 = vadd.f32 %v416_v63, %v387_v62 }
  0xd1   :  { %v472_v0 = vadd.f32 %v471_v60, %v443_v61 }
  0xd3   :  { %v495_v2 = vsel %vm479_vm0, %v472_v0, 0.0 }
  0xd4   :  { %496 = vadd.xlane.f32.xlu2 %v495_v2 }
  0xd6   :  { %v445_v3 = vpop.f32.mrf.mxu2  ;;  %v389_v7 = vpop.f32.mrf.mxu0 }
  0xd7   :  { %v474_v4 = vpop.f32.mrf.mxu3  ;;  %v446_v5 = vadd.f32 %v445_v3, %v417_v1  ;;  %v418_v8 = vpop.f32.mrf.mxu1 }
  0xd8   :  { %v419_v10 = vadd.f32 %v418_v8, %v389_v7 }
  0xd9   :  { %v475_v6 = vadd.f32 %v474_v4, %v446_v5 }
  0xdb   :  { %v498_v9 = vsel %vm479_vm0, %v475_v6, 0.0 }
  0xdc   :  { %499 = vadd.xlane.f32.xlu0 %v498_v9 }
  0xde   :  { %v447_v11 = vpop.f32.mrf.mxu2 }
  0xdf   :  { %v448_v12 = vadd.f32 %v447_v11, %v419_v10  ;;  %v476_v13 = vpop.f32.mrf.mxu3 }
  0xe1   :  { %v477_v14 = vadd.f32 %v476_v13, %v448_v12 }
  0xe3   :  { %v501_v15 = vsel %vm479_vm0, %v477_v14, 0.0 }
  0xe4   :  { %502 = vadd.xlane.f32.xlu1 %v501_v15 }
 0x11f   :  { %v482_v23 = vpop.xlane.xlu0 %481 }
 0x120   :  { %v511_v25 = vmul.f32 %v1181_v22, %v482_v23 }
 0x122   :  { %v1185_v26 = vsub.f32 %v1158_v24, %v511_v25 }
 0x124   :  { %v527_v27 = vmul.f32 %v1185_v26, %v1185_v26 }
 0x126   :  { %v535_v28 = vsel %vm479_vm0, %v527_v27, 0.0 }
 0x127   :  { %536 = vadd.xlane.f32.xlu2 %v535_v28  ;;  %v485_v29 = vpop.xlane.xlu0 %484 }
 0x128   :  { %v512_v30 = vmul.f32 %v1181_v22, %v485_v29 }
 0x12a   :  { %v1192_v31 = vsub.f32 %v1162_v32, %v512_v30 }
 0x12c   :  { %v528_v33 = vmul.f32 %v1192_v31, %v1192_v31 }
 0x12e   :  { %v538_v34 = vsel %vm479_vm0, %v528_v33, 0.0 }
 0x12f   :  { %v488_v35 = vpop.xlane.xlu1 %487  ;;  %539 = vadd.xlane.f32.xlu0 %v538_v34 }
 0x130   :  { %v513_v24 = vmul.f32 %v1181_v22, %v488_v35 }
 0x132   :  { %v1199_v36 = vsub.f32 %v1166_v40, %v513_v24 }
 0x134   :  { %v529_v37 = vmul.f32 %v1199_v36, %v1199_v36 }
 0x136   :  { %v541_v38 = vsel %vm479_vm0, %v529_v37, 0.0 }
 0x137   :  { %542 = vadd.xlane.f32.xlu1 %v541_v38  ;;  %v491_v32 = vpop.xlane.xlu1 %490 }
 0x138   :  { %v514_v39 = vmul.f32 %v1181_v22, %v491_v32 }
 0x13a   :  { %v1206_v41 = vsub.f32 %v1170_v48, %v514_v39 }
 0x13c   :  { %v530_v42 = vmul.f32 %v1206_v41, %v1206_v41 }
 0x13e   :  { %v544_v43 = vsel %vm479_vm0, %v530_v42, 0.0 }
 0x13f   :  { %v494_v44 = vpop.xlane.xlu2 %493  ;;  %545 = vadd.xlane.f32.xlu2 %v544_v43 }
 0x140   :  { %v515_v40 = vmul.f32 %v1181_v22, %v494_v44 }
 0x142   :  { %v1213_v45 = vsub.f32 %v1174_v56, %v515_v40 }
 0x144   :  { %v531_v46 = vmul.f32 %v1213_v45, %v1213_v45 }
 0x146   :  { %v547_v47 = vsel %vm479_vm0, %v531_v46, 0.0 }
 0x147   :  { %v497_v49 = vpop.xlane.xlu2 %496  ;;  %548 = vadd.xlane.f32.xlu0 %v547_v47 }
 0x148   :  { %v516_v48 = vmul.f32 %v1181_v22, %v497_v49 }
 0x14a   :  { %v1219_v50 = vsub.f32 %v472_v0, %v516_v48 }
 0x14c   :  { %v532_v51 = vmul.f32 %v1219_v50, %v1219_v50 }
 0x14e   :  { %v550_v52 = vsel %vm479_vm0, %v532_v51, 0.0 }
 0x14f   :  { %551 = vadd.xlane.f32.xlu1 %v550_v52  ;;  %v500_v53 = vpop.xlane.xlu0 %499 }
 0x150   :  { %v517_v54 = vmul.f32 %v1181_v22, %v500_v53 }
 0x152   :  { %v1225_v55 = vsub.f32 %v475_v6, %v517_v54 }
 0x154   :  { %v533_v56 = vmul.f32 %v1225_v55, %v1225_v55 }
 0x156   :  { %v553_v57 = vsel %vm479_vm0, %v533_v56, 0.0 }
 0x157   :  { %v503_v58 = vpop.xlane.xlu1 %502  ;;  %554 = vadd.xlane.f32.xlu2 %v553_v57 }
 0x158   :  { %v518_v59 = vmul.f32 %v1181_v22, %v503_v58 }
 0x15a   :  { %v1231_v60 = vsub.f32 %v477_v14, %v518_v59 }
 0x15c   :  { %v534_v61 = vmul.f32 %v1231_v60, %v1231_v60 }
 0x15e   :  { %v556_v62 = vsel %vm479_vm0, %v534_v61, 0.0 }
 0x15f   :  { %557 = vadd.xlane.f32.xlu0 %v556_v62 }
 0x19a   :  { %v537_v63 = vpop.xlane.xlu2 %536 }
 0x19b   :  { %v559_v0 = vmul.f32 %v537_v63, %v1181_v22 }
 0x19d   :  { %v567_v1 = vadd.f32 1e-05, %v559_v0 }
 0x19f   :  { %934 = vrsqrt.f32 %v567_v1  ;;  %vm581_vm3 = vweird.f32 %v567_v1 }
 0x1a2   :  { %v540_v2 = vpop.xlane.xlu0 %539 }
 0x1a3   :  { %v560_v3 = vmul.f32 %v540_v2, %v1181_v22 }
 0x1a5   :  { %v935_v4 = vpop.eup %934  ;;  %v568_v5 = vadd.f32 1e-05, %v560_v3 }
 0x1a6   :  { %v576_v6 = vmul.f32 %v935_v4, %v567_v1  ;;  %vm582_vm2 = vweird.f32 %v935_v4 }
 0x1a7   :  { %936 = vrsqrt.f32 %v568_v5  ;;  %vm583_vm4 = vmor %vm581_vm3, %vm582_vm2  ;;  %vm591_vm6 = vweird.f32 %v568_v5 }
 0x1a8   :  { %v577_v7 = vmul.f32 %v935_v4, %v576_v6 }
 0x1aa   :  { %v578_v8 = vmul.f32 0.5, %v577_v7  ;;  %v543_v9 = vpop.xlane.xlu1 %542 }
 0x1ab   :  { %v561_v10 = vmul.f32 %v543_v9, %v1181_v22 }
 0x1ac   :  { %v579_v11 = vsub.f32 1.5, %v578_v8 }
 0x1ad   :  { %v937_v12 = vpop.eup %936  ;;  %v569_v13 = vadd.f32 1e-05, %v561_v10 }
 0x1ae   :  { %v580_v14 = vmul.f32 %v935_v4, %v579_v11  ;;  %v586_v15 = vmul.f32 %v937_v12, %v568_v5  ;;  %vm592_vm5 = vweird.f32 %v937_v12 }
 0x1af   :  { %938 = vrsqrt.f32 %v569_v13  ;;  %vm593_vm7 = vmor %vm591_vm6, %vm592_vm5  ;;  %vm601_vm9 = vweird.f32 %v569_v13 }
 0x1b0   :  { %v584_v16 = vsel %vm583_vm4, %v935_v4, %v580_v14  ;;  %v587_v17 = vmul.f32 %v937_v12, %v586_v15 }
 0x1b1   :  { %v655_v18 = vmul.f32 %v584_v16, %v1185_v26 }
 0x1b2   :  { %v588_v19 = vmul.f32 0.5, %v587_v17  ;;  %v546_v20 = vpop.xlane.xlu2 %545 }
 0x1b3   :  { %v663_v21 = vmul.f32 0.2, %v655_v18  ;;  %v562_v23 = vmul.f32 %v546_v20, %v1181_v22 }
 0x1b4   :  { %v589_v25 = vsub.f32 1.5, %v588_v19 }
 0x1b5   :  { %v939_v27 = vpop.eup %938  ;;  %v671_v28 = vmax.f32 %v655_v18, %v663_v21  ;;  %v570_v29 = vadd.f32 1e-05, %v562_v23 }
 0x1b6   :  { %v590_v30 = vmul.f32 %v937_v12, %v589_v25  ;;  %v596_v33 = vmul.f32 %v939_v27, %v569_v13  ;;  %vm602_vm8 = vweird.f32 %v939_v27 }
 0x1b7   :  { %679 = vst.msk [vmem:[%s1286_s2] sm:$0xff] %vm479_vm0, %v671_v28  ;;  %940 = vrsqrt.f32 %v570_v29  ;;  %vm603_vm10 = vmor %vm601_vm9, %vm602_vm8  ;;  %vm611_vm12 = vweird.f32 %v570_v29 }
 0x1b8   :  { %v594_v26 = vsel %vm593_vm7, %v937_v12, %v590_v30  ;;  %v597_v34 = vmul.f32 %v939_v27, %v596_v33 }
 0x1b9   :  { %v656_v35 = vmul.f32 %v594_v26, %v1192_v31 }
 0x1ba   :  { %v598_v24 = vmul.f32 0.5, %v597_v34  ;;  %v549_v37 = vpop.xlane.xlu0 %548 }
 0x1bb   :  { %v664_v38 = vmul.f32 0.2, %v656_v35  ;;  %v563_v32 = vmul.f32 %v549_v37, %v1181_v22 }
 0x1bc   :  { %v599_v39 = vsub.f32 1.5, %v598_v24 }
 0x1bd   :  { %v941_v42 = vpop.eup %940  ;;  %v672_v43 = vmax.f32 %v656_v35, %v664_v38  ;;  %v571_v44 = vadd.f32 1e-05, %v563_v32 }
 0x1be   :  { %v600_v40 = vmul.f32 %v939_v27, %v599_v39  ;;  %v606_v46 = vmul.f32 %v941_v42, %v570_v29  ;;  %vm612_vm11 = vweird.f32 %v941_v42 }
 0x1bf   :  { %680 = vst.msk [vmem:[%s1286_s2 + $0x8] sm:$0xff] %vm479_vm0, %v672_v43  ;;  %942 = vrsqrt.f32 %v571_v44  ;;  %vm613_vm13 = vmor %vm611_vm12, %vm612_vm11  ;;  %vm621_vm15 = vweird.f32 %v571_v44 }
 0x1c0   :  { %v604_v31 = vsel %vm603_vm10, %v939_v27, %v600_v40  ;;  %v607_v47 = vmul.f32 %v941_v42, %v606_v46 }
 0x1c1   :  { %v657_v49 = vmul.f32 %v604_v31, %v1199_v36 }
 0x1c2   :  { %v608_v48 = vmul.f32 0.5, %v607_v47  ;;  %v552_v51 = vpop.xlane.xlu1 %551 }
 0x1c3   :  { %v665_v52 = vmul.f32 0.2, %v657_v49  ;;  %v564_v53 = vmul.f32 %v552_v51, %v1181_v22 }
 0x1c4   :  { %v609_v54 = vsub.f32 1.5, %v608_v48 }
 0x1c5   :  { %v943_v56 = vpop.eup %942  ;;  %v673_v57 = vmax.f32 %v657_v49, %v665_v52  ;;  %v572_v58 = vadd.f32 1e-05, %v564_v53 }
 0x1c6   :  { %v610_v59 = vmul.f32 %v941_v42, %v609_v54  ;;  %v616_v61 = vmul.f32 %v943_v56, %v571_v44  ;;  %vm622_vm14 = vweird.f32 %v943_v56 }
 0x1c7   :  { %681 = vst.msk [vmem:[%s1286_s2 + $0x10] sm:$0xff] %vm479_vm0, %v673_v57  ;;  %944 = vrsqrt.f32 %v572_v58  ;;  %vm623_vm1 = vmor %vm621_vm15, %vm622_vm14  ;;  %vm631_vm3 = vweird.f32 %v572_v58 }
 0x1c8   :  { %v614_v36 = vsel %vm613_vm13, %v941_v42, %v610_v59  ;;  %v617_v62 = vmul.f32 %v943_v56, %v616_v61 }
 0x1c9   :  { %v658_v63 = vmul.f32 %v614_v36, %v1206_v41 }
 0x1ca   :  { %v618_v0 = vmul.f32 0.5, %v617_v62  ;;  %v555_v1 = vpop.xlane.xlu2 %554 }
 0x1cb   :  { %v666_v2 = vmul.f32 0.2, %v658_v63  ;;  %v565_v3 = vmul.f32 %v555_v1, %v1181_v22 }
 0x1cc   :  { %v619_v4 = vsub.f32 1.5, %v618_v0 }
 0x1cd   :  { %v945_v5 = vpop.eup %944  ;;  %v674_v6 = vmax.f32 %v658_v63, %v666_v2  ;;  %v573_v7 = vadd.f32 1e-05, %v565_v3 }
 0x1ce   :  { %v620_v8 = vmul.f32 %v943_v56, %v619_v4  ;;  %v626_v9 = vmul.f32 %v945_v5, %v572_v58  ;;  %vm632_vm2 = vweird.f32 %v945_v5 }
 0x1cf   :  { %682 = vst.msk [vmem:[%s1286_s2 + $0x18] sm:$0xff] %vm479_vm0, %v674_v6  ;;  %946 = vrsqrt.f32 %v573_v7  ;;  %vm633_vm4 = vmor %vm631_vm3, %vm632_vm2  ;;  %vm641_vm6 = vweird.f32 %v573_v7 }
 0x1d0   :  { %v624_v41 = vsel %vm623_vm1, %v943_v56, %v620_v8  ;;  %v627_v10 = vmul.f32 %v945_v5, %v626_v9 }
 0x1d1   :  { %v659_v11 = vmul.f32 %v624_v41, %v1213_v45 }
 0x1d2   :  { %v628_v12 = vmul.f32 0.5, %v627_v10  ;;  %v558_v13 = vpop.xlane.xlu0 %557 }
 0x1d3   :  { %v667_v14 = vmul.f32 0.2, %v659_v11  ;;  %v566_v15 = vmul.f32 %v558_v13, %v1181_v22 }
 0x1d4   :  { %v629_v16 = vsub.f32 1.5, %v628_v12 }
 0x1d5   :  { %v947_v17 = vpop.eup %946  ;;  %v675_v18 = vmax.f32 %v659_v11, %v667_v14  ;;  %v574_v19 = vadd.f32 1e-05, %v566_v15 }
 0x1d6   :  { %v630_v20 = vmul.f32 %v945_v5, %v629_v16  ;;  %v636_v21 = vmul.f32 %v947_v17, %v573_v7  ;;  %vm642_vm5 = vweird.f32 %v947_v17 }
 0x1d7   :  { %683 = vst.msk [vmem:[%s1286_s2 + $0x20] sm:$0xff] %vm479_vm0, %v675_v18  ;;  %948 = vrsqrt.f32 %v574_v19  ;;  %vm643_vm7 = vmor %vm641_vm6, %vm642_vm5  ;;  %vm651_vm9 = vweird.f32 %v574_v19 }
 0x1d8   :  { %v634_v45 = vsel %vm633_vm4, %v945_v5, %v630_v20  ;;  %v637_v23 = vmul.f32 %v947_v17, %v636_v21 }
 0x1d9   :  { %v660_v25 = vmul.f32 %v634_v45, %v1219_v50 }
 0x1da   :  { %v638_v22 = vmul.f32 0.5, %v637_v23 }
 0x1db   :  { %v668_v27 = vmul.f32 0.2, %v660_v25 }
 0x1dc   :  { %v639_v28 = vsub.f32 1.5, %v638_v22 }
 0x1dd   :  { %v949_v29 = vpop.eup %948  ;;  %v676_v30 = vmax.f32 %v660_v25, %v668_v27 }
 0x1de   :  { %v640_v33 = vmul.f32 %v947_v17, %v639_v28  ;;  %v646_v26 = vmul.f32 %v949_v29, %v574_v19  ;;  %vm652_vm8 = vweird.f32 %v949_v29 }
 0x1df   :  { %684 = vst.msk [vmem:[%s1286_s2 + $0x28] sm:$0xff] %vm479_vm0, %v676_v30  ;;  %vm653_vm10 = vmor %vm651_vm9, %vm652_vm8 }
 0x1e0   :  { %v644_v34 = vsel %vm643_vm7, %v947_v17, %v640_v33  ;;  %v647_v35 = vmul.f32 %v949_v29, %v646_v26 }
 0x1e1   :  { %v661_v24 = vmul.f32 %v644_v34, %v1225_v55 }
 0x1e2   :  { %v648_v50 = vmul.f32 0.5, %v647_v35 }
 0x1e3   :  { %v669_v37 = vmul.f32 0.2, %v661_v24 }
 0x1e4   :  { %v649_v38 = vsub.f32 1.5, %v648_v50 }
 0x1e5   :  { %v677_v32 = vmax.f32 %v661_v24, %v669_v37 }
 0x1e6   :  { %v650_v39 = vmul.f32 %v949_v29, %v649_v38 }
 0x1e7   :  { %685 = vst.msk [vmem:[%s1286_s2 + $0x30] sm:$0xff] %vm479_vm0, %v677_v32 }
 0x1e8   :  { %v654_v42 = vsel %vm653_vm10, %v949_v29, %v650_v39 }
 0x1e9   :  { %v662_v43 = vmul.f32 %v654_v42, %v1231_v60 }
 0x1eb   :  { %v670_v44 = vmul.f32 0.2, %v662_v43 }
 0x1ed   :  { %v678_v40 = vmax.f32 %v662_v43, %v670_v44 }
 0x1ef   :  { %686 = vst.msk [vmem:[%s1286_s2 + $0x38] sm:$0xff] %vm479_vm0, %v678_v40 }

</bundles_post_ra>
